<compile_context>
chip_gen: v7x
topology: tpu7x:2x2x1
jax: 0.10.0
libtpu: 0.0.40
codegen_flags: <defaults>
</compile_context>

<pallas_src>
import jax
import jax.numpy as jnp
from jax import lax
from jax.experimental import pallas as pl
from jax.experimental.pallas import tpu as pltpu


def _gelu(x):
    # exact (erf) GELU, matching torch.nn.GELU() default
    return 0.5 * x * (1.0 + lax.erf(x * 0.7071067811865476))


def _layer_norm(x, gamma, beta, eps=1e-5):
    # matches torch.nn.LayerNorm over the last dim (biased variance, eps inside rsqrt)
    mu = jnp.mean(x, axis=-1, keepdims=True)
    var = jnp.mean(jnp.square(x - mu), axis=-1, keepdims=True)
    return (x - mu) * lax.rsqrt(var + eps) * gamma + beta


def lstm_model_kernel(
    x_ref,                                   # [S*Bp, D]  time-major, batch padded to Bp
    w1_ref, b1_ref, g1_ref, be1_ref,         # input_net Linear + LayerNorm
    wih_ref, bl_ref,                         # LSTM input weights [H,4H], combined bias [1,4H]
    whhi_ref, whhf_ref, whhg_ref, whho_ref,  # LSTM recurrent weights, per-gate [H,H]
    wo1_ref, bo1_ref, g2_ref, be2_ref,       # output_net Linear1 + LayerNorm
    wo2_ref, bo2_ref,                        # output_net Linear2 -> pred_len
    out_ref,                                 # [Bp, P]
):
    Bp, _ = out_ref.shape
    SB, _ = x_ref.shape
    S = SB // Bp
    H = w1_ref.shape[1]

    # ---- input_net: Linear -> GELU -> LayerNorm (Dropout == identity in eval) ----
    xp = jnp.dot(x_ref[...], w1_ref[...], preferred_element_type=jnp.float32) + b1_ref[...]
    xp = _gelu(xp)
    xp = _layer_norm(xp, g1_ref[...], be1_ref[...])          # [S*Bp, H]

    # ---- hoisted input->gate projection for ALL timesteps (one MXU pass) ----
    # PyTorch gate order (i, f, g, o); combined bias (b_ih + b_hh) folded in here.
    zx = jnp.dot(xp, wih_ref[...], preferred_element_type=jnp.float32) + bl_ref[...]  # [S*Bp, 4H]
    # One-time per-gate split, kept time-major so each step is a static leading-dim pick.
    zxi = zx[:, 0:H].reshape(S, Bp, H)
    zxf = zx[:, H:2 * H].reshape(S, Bp, H)
    zxg = zx[:, 2 * H:3 * H].reshape(S, Bp, H)
    zxo = zx[:, 3 * H:4 * H].reshape(S, Bp, H)

    whhi = whhi_ref[...]
    whhf = whhf_ref[...]
    whhg = whhg_ref[...]
    whho = whho_ref[...]

    # ---- single-layer LSTM, h0 = c0 = 0, fully unrolled (S is static) ----
    h = jnp.zeros((Bp, H), jnp.float32)
    c = jnp.zeros((Bp, H), jnp.float32)
    for t in range(S):
        i = jax.nn.sigmoid(zxi[t] + jnp.dot(h, whhi, preferred_element_type=jnp.float32))
        f = jax.nn.sigmoid(zxf[t] + jnp.dot(h, whhf, preferred_element_type=jnp.float32))
        g = jnp.tanh(zxg[t] + jnp.dot(h, whhg, preferred_element_type=jnp.float32))
        o = jax.nn.sigmoid(zxo[t] + jnp.dot(h, whho, preferred_element_type=jnp.float32))
        c = f * c + i * g
        h = o * jnp.tanh(c)
    # h == lstm_out[:, -1, :]

    # ---- output_net: Linear -> LayerNorm -> GELU -> Linear ----
    y = jnp.dot(h, wo1_ref[...], preferred_element_type=jnp.float32) + bo1_ref[...]
    y = _layer_norm(y, g2_ref[...], be2_ref[...])
    y = _gelu(y)
    y = jnp.dot(y, wo2_ref[...], preferred_element_type=jnp.float32) + bo2_ref[...]
    out_ref[...] = y.astype(out_ref.dtype)


def lstm_model_forward(x_enc, params):
    """x_enc: [B, S, D] float32 -> [B, pred_len, 1] (matches out.unsqueeze(-1))."""
    B, S, D = x_enc.shape
    H = params["w1"].shape[1]
    P = params["wo2"].shape[1]

    # Pad batch to a full 8-sublane tile and present a time-major flattened [S*Bp, D]
    # slab to the kernel (layout plumbing done in the wrapper, not the kernel).
    Bp = max(8, ((B + 7) // 8) * 8)
    x_pad = jnp.pad(x_enc, ((0, Bp - B), (0, 0), (0, 0)))
    x_tm = jnp.transpose(x_pad, (1, 0, 2)).reshape(S * Bp, D)

    # Pre-split recurrent weights per gate (i, f, g, o) so every per-step matmul is
    # lane-aligned inside the kernel.
    whh = params["whh"]
    whh_i = whh[:, 0:H]
    whh_f = whh[:, H:2 * H]
    whh_g = whh[:, 2 * H:3 * H]
    whh_o = whh[:, 3 * H:4 * H]

    args = (
        x_tm,
        params["w1"], params["b1"], params["ln1_g"], params["ln1_b"],
        params["wih"], params["b_lstm"],
        whh_i, whh_f, whh_g, whh_o,
        params["wo1"], params["bo1"], params["ln2_g"], params["ln2_b"],
        params["wo2"], params["bo2"],
    )
    vmem = pl.BlockSpec(memory_space=pltpu.MemorySpace.VMEM)
    out = pl.pallas_call(
        lstm_model_kernel,
        out_shape=jax.ShapeDtypeStruct((Bp, P), jnp.float32),
        in_specs=[vmem] * len(args),
        out_specs=vmem,
    )(*args)
    # TODO(synk): at realistic batch sizes add a batch grid (dimension_semantics=("parallel",))
    # for v7x megacore sharding / VMEM budget; gridless is optimal at this toy config.
    return out[:B, :, None]   # [B, pred_len, 1]


def init_params(key, input_dim, hidden_dim, pred_len):
    ks = jax.random.split(key, 8)
    s = 0.1
    return {
        # input_net
        "w1": jax.random.normal(ks[0], (input_dim, hidden_dim), jnp.float32) * s,
        "b1": jnp.zeros((1, hidden_dim), jnp.float32),
        "ln1_g": jnp.ones((1, hidden_dim), jnp.float32),
        "ln1_b": jnp.zeros((1, hidden_dim), jnp.float32),
        # LSTM (weights pre-transposed to (in, 4H); bias = bias_ih + bias_hh)
        "wih": jax.random.normal(ks[1], (hidden_dim, 4 * hidden_dim), jnp.float32) * s,
        "whh": jax.random.normal(ks[2], (hidden_dim, 4 * hidden_dim), jnp.float32) * s,
        "b_lstm": jax.random.normal(ks[3], (1, 4 * hidden_dim), jnp.float32) * s,
        # output_net
        "wo1": jax.random.normal(ks[4], (hidden_dim, hidden_dim), jnp.float32) * s,
        "bo1": jnp.zeros((1, hidden_dim), jnp.float32),
        "ln2_g": jnp.ones((1, hidden_dim), jnp.float32),
        "ln2_b": jnp.zeros((1, hidden_dim), jnp.float32),
        "wo2": jax.random.normal(ks[5], (hidden_dim, pred_len), jnp.float32) * s,
        "bo2": jnp.zeros((1, pred_len), jnp.float32),
    }


if __name__ == "__main__":
    # config: enc_in=4, seq_len=8, pred_len=4, d_model=32
    B, S, D, H, P = 2, 8, 4, 32, 4

    key = jax.random.PRNGKey(0)
    k_x, k_p = jax.random.split(key)
    x_enc = jax.random.normal(k_x, (B, S, D), jnp.float32)
    params = init_params(k_p, D, H, P)

    out = lstm_model_forward(x_enc, params)
    jax.block_until_ready(out)
    assert out.shape == (B, P, 1), out.shape
    assert bool(jnp.all(jnp.isfinite(out)))
    print("KERNEL_OK")
</pallas_src>

<mosaic_0001>
module attributes {stable_mosaic.version = 11 : i64} {
  func.func @lstm_model_kernel(%arg0: memref<64x4xf32, #tpu.memory_space<vmem>>, %arg1: memref<4x32xf32, #tpu.memory_space<vmem>>, %arg2: memref<1x32xf32, #tpu.memory_space<vmem>>, %arg3: memref<1x32xf32, #tpu.memory_space<vmem>>, %arg4: memref<1x32xf32, #tpu.memory_space<vmem>>, %arg5: memref<32x128xf32, #tpu.memory_space<vmem>>, %arg6: memref<1x128xf32, #tpu.memory_space<vmem>>, %arg7: memref<32x32xf32, #tpu.memory_space<vmem>>, %arg8: memref<32x32xf32, #tpu.memory_space<vmem>>, %arg9: memref<32x32xf32, #tpu.memory_space<vmem>>, %arg10: memref<32x32xf32, #tpu.memory_space<vmem>>, %arg11: memref<32x32xf32, #tpu.memory_space<vmem>>, %arg12: memref<1x32xf32, #tpu.memory_space<vmem>>, %arg13: memref<1x32xf32, #tpu.memory_space<vmem>>, %arg14: memref<1x32xf32, #tpu.memory_space<vmem>>, %arg15: memref<32x4xf32, #tpu.memory_space<vmem>>, %arg16: memref<1x4xf32, #tpu.memory_space<vmem>>, %arg17: memref<8x4xf32, #tpu.memory_space<vmem>>) attributes {dimension_semantics = [], scalar_prefetch = 0 : i64, scratch_operands = 0 : i64, tpu.core_type = #tpu.core_type<tc>} {
    %c0 = arith.constant 0 : index
    %c0_0 = arith.constant 0 : index
    %0 = vector.load %arg0[%c0, %c0_0] : memref<64x4xf32, #tpu.memory_space<vmem>>, vector<64x4xf32>
    %c0_1 = arith.constant 0 : index
    %c0_2 = arith.constant 0 : index
    %1 = vector.load %arg1[%c0_1, %c0_2] : memref<4x32xf32, #tpu.memory_space<vmem>>, vector<4x32xf32>
    %cst = arith.constant dense<0.000000e+00> : vector<64x32xf32>
    %2 = tpu.matmul %0, %1, %cst {dimension_numbers = #tpu.dot_dimension_numbers<[1], [0], [0], [1], [0, 0, 1, 1], [], []>} : vector<64x4xf32>, vector<4x32xf32>, vector<64x32xf32> -> vector<64x32xf32>
    %c0_3 = arith.constant 0 : index
    %c0_4 = arith.constant 0 : index
    %3 = vector.load %arg2[%c0_3, %c0_4] : memref<1x32xf32, #tpu.memory_space<vmem>>, vector<1x32xf32>
    %4 = vector.broadcast %3 : vector<1x32xf32> to vector<64x32xf32>
    %5 = arith.addf %2, %4 : vector<64x32xf32>
    %cst_5 = arith.constant 5.000000e-01 : f32
    %6 = vector.broadcast %cst_5 : f32 to vector<64x32xf32>
    %7 = arith.mulf %6, %5 : vector<64x32xf32>
    %cst_6 = arith.constant 0.707106769 : f32
    %8 = vector.broadcast %cst_6 : f32 to vector<64x32xf32>
    %9 = arith.mulf %5, %8 : vector<64x32xf32>
    %10 = math.erf %9 : vector<64x32xf32>
    %cst_7 = arith.constant 1.000000e+00 : f32
    %11 = vector.broadcast %cst_7 : f32 to vector<64x32xf32>
    %12 = arith.addf %11, %10 : vector<64x32xf32>
    %13 = arith.mulf %7, %12 : vector<64x32xf32>
    %c0_8 = arith.constant 0 : index
    %c0_9 = arith.constant 0 : index
    %14 = vector.load %arg3[%c0_8, %c0_9] : memref<1x32xf32, #tpu.memory_space<vmem>>, vector<1x32xf32>
    %c0_10 = arith.constant 0 : index
    %c0_11 = arith.constant 0 : index
    %15 = vector.load %arg4[%c0_10, %c0_11] : memref<1x32xf32, #tpu.memory_space<vmem>>, vector<1x32xf32>
    %cst_12 = arith.constant dense<0.000000e+00> : vector<64xf32>
    %16 = vector.multi_reduction <add>, %13, %cst_12 [1] : vector<64x32xf32> to vector<64xf32>
    %17 = vector.shape_cast %16 : vector<64xf32> to vector<64x1xf32>
    %cst_13 = arith.constant 3.200000e+01 : f32
    %18 = vector.broadcast %cst_13 : f32 to vector<64x1xf32>
    %19 = arith.divf %17, %18 : vector<64x1xf32>
    %20 = vector.broadcast %19 : vector<64x1xf32> to vector<64x32xf32>
    %21 = arith.subf %13, %20 : vector<64x32xf32>
    %22 = arith.mulf %21, %21 : vector<64x32xf32>
    %cst_14 = arith.constant dense<0.000000e+00> : vector<64xf32>
    %23 = vector.multi_reduction <add>, %22, %cst_14 [1] : vector<64x32xf32> to vector<64xf32>
    %24 = vector.shape_cast %23 : vector<64xf32> to vector<64x1xf32>
    %cst_15 = arith.constant 3.200000e+01 : f32
    %25 = vector.broadcast %cst_15 : f32 to vector<64x1xf32>
    %26 = arith.divf %24, %25 : vector<64x1xf32>
    %27 = vector.broadcast %19 : vector<64x1xf32> to vector<64x32xf32>
    %28 = arith.subf %13, %27 : vector<64x32xf32>
    %cst_16 = arith.constant 9.99999974E-6 : f32
    %29 = vector.broadcast %cst_16 : f32 to vector<64x1xf32>
    %30 = arith.addf %26, %29 : vector<64x1xf32>
    %31 = math.rsqrt %30 : vector<64x1xf32>
    %32 = vector.broadcast %31 : vector<64x1xf32> to vector<64x32xf32>
    %33 = arith.mulf %28, %32 : vector<64x32xf32>
    %34 = vector.broadcast %14 : vector<1x32xf32> to vector<64x32xf32>
    %35 = arith.mulf %33, %34 : vector<64x32xf32>
    %36 = vector.broadcast %15 : vector<1x32xf32> to vector<64x32xf32>
    %37 = arith.addf %35, %36 : vector<64x32xf32>
    %c0_17 = arith.constant 0 : index
    %c0_18 = arith.constant 0 : index
    %38 = vector.load %arg5[%c0_17, %c0_18] : memref<32x128xf32, #tpu.memory_space<vmem>>, vector<32x128xf32>
    %cst_19 = arith.constant dense<0.000000e+00> : vector<64x128xf32>
    %39 = tpu.matmul %37, %38, %cst_19 {dimension_numbers = #tpu.dot_dimension_numbers<[1], [0], [0], [1], [0, 0, 1, 1], [], []>} : vector<64x32xf32>, vector<32x128xf32>, vector<64x128xf32> -> vector<64x128xf32>
    %c0_20 = arith.constant 0 : index
    %c0_21 = arith.constant 0 : index
    %40 = vector.load %arg6[%c0_20, %c0_21] : memref<1x128xf32, #tpu.memory_space<vmem>>, vector<1x128xf32>
    %41 = vector.broadcast %40 : vector<1x128xf32> to vector<64x128xf32>
    %42 = arith.addf %39, %41 : vector<64x128xf32>
    %43 = vector.extract_strided_slice %42 {offsets = [0, 0], sizes = [64, 32], strides = [1, 1]} : vector<64x128xf32> to vector<64x32xf32>
    %44 = vector.shape_cast %43 : vector<64x32xf32> to vector<8x8x32xf32>
    %45 = vector.extract_strided_slice %42 {offsets = [0, 32], sizes = [64, 32], strides = [1, 1]} : vector<64x128xf32> to vector<64x32xf32>
    %46 = vector.shape_cast %45 : vector<64x32xf32> to vector<8x8x32xf32>
    %47 = vector.extract_strided_slice %42 {offsets = [0, 64], sizes = [64, 32], strides = [1, 1]} : vector<64x128xf32> to vector<64x32xf32>
    %48 = vector.shape_cast %47 : vector<64x32xf32> to vector<8x8x32xf32>
    %49 = vector.extract_strided_slice %42 {offsets = [0, 96], sizes = [64, 32], strides = [1, 1]} : vector<64x128xf32> to vector<64x32xf32>
    %50 = vector.shape_cast %49 : vector<64x32xf32> to vector<8x8x32xf32>
    %c0_22 = arith.constant 0 : index
    %c0_23 = arith.constant 0 : index
    %51 = vector.load %arg7[%c0_22, %c0_23] : memref<32x32xf32, #tpu.memory_space<vmem>>, vector<32x32xf32>
    %c0_24 = arith.constant 0 : index
    %c0_25 = arith.constant 0 : index
    %52 = vector.load %arg8[%c0_24, %c0_25] : memref<32x32xf32, #tpu.memory_space<vmem>>, vector<32x32xf32>
    %c0_26 = arith.constant 0 : index
    %c0_27 = arith.constant 0 : index
    %53 = vector.load %arg9[%c0_26, %c0_27] : memref<32x32xf32, #tpu.memory_space<vmem>>, vector<32x32xf32>
    %c0_28 = arith.constant 0 : index
    %c0_29 = arith.constant 0 : index
    %54 = vector.load %arg10[%c0_28, %c0_29] : memref<32x32xf32, #tpu.memory_space<vmem>>, vector<32x32xf32>
    %cst_30 = arith.constant 0.000000e+00 : f32
    %55 = vector.broadcast %cst_30 : f32 to vector<8x32xf32>
    %cst_31 = arith.constant 0.000000e+00 : f32
    %56 = vector.broadcast %cst_31 : f32 to vector<8x32xf32>
    %57 = vector.extract_strided_slice %44 {offsets = [0, 0, 0], sizes = [1, 8, 32], strides = [1, 1, 1]} : vector<8x8x32xf32> to vector<1x8x32xf32>
    %58 = vector.shape_cast %57 : vector<1x8x32xf32> to vector<8x32xf32>
    %cst_32 = arith.constant dense<0.000000e+00> : vector<8x32xf32>
    %59 = tpu.matmul %55, %51, %cst_32 {dimension_numbers = #tpu.dot_dimension_numbers<[1], [0], [0], [1], [0, 0, 1, 1], [], []>} : vector<8x32xf32>, vector<32x32xf32>, vector<8x32xf32> -> vector<8x32xf32>
    %60 = arith.addf %58, %59 : vector<8x32xf32>
    %61 = arith.negf %60 : vector<8x32xf32>
    %62 = math.exp %61 : vector<8x32xf32>
    %cst_33 = arith.constant 1.000000e+00 : f32
    %63 = vector.broadcast %cst_33 : f32 to vector<8x32xf32>
    %64 = arith.addf %63, %62 : vector<8x32xf32>
    %65 = arith.divf %63, %64 : vector<8x32xf32>
    %66 = vector.extract_strided_slice %46 {offsets = [0, 0, 0], sizes = [1, 8, 32], strides = [1, 1, 1]} : vector<8x8x32xf32> to vector<1x8x32xf32>
    %67 = vector.shape_cast %66 : vector<1x8x32xf32> to vector<8x32xf32>
    %cst_34 = arith.constant dense<0.000000e+00> : vector<8x32xf32>
    %68 = tpu.matmul %55, %52, %cst_34 {dimension_numbers = #tpu.dot_dimension_numbers<[1], [0], [0], [1], [0, 0, 1, 1], [], []>} : vector<8x32xf32>, vector<32x32xf32>, vector<8x32xf32> -> vector<8x32xf32>
    %69 = arith.addf %67, %68 : vector<8x32xf32>
    %70 = arith.negf %69 : vector<8x32xf32>
    %71 = math.exp %70 : vector<8x32xf32>
    %cst_35 = arith.constant 1.000000e+00 : f32
    %72 = vector.broadcast %cst_35 : f32 to vector<8x32xf32>
    %73 = arith.addf %72, %71 : vector<8x32xf32>
    %74 = arith.divf %72, %73 : vector<8x32xf32>
    %75 = vector.extract_strided_slice %48 {offsets = [0, 0, 0], sizes = [1, 8, 32], strides = [1, 1, 1]} : vector<8x8x32xf32> to vector<1x8x32xf32>
    %76 = vector.shape_cast %75 : vector<1x8x32xf32> to vector<8x32xf32>
    %cst_36 = arith.constant dense<0.000000e+00> : vector<8x32xf32>
    %77 = tpu.matmul %55, %53, %cst_36 {dimension_numbers = #tpu.dot_dimension_numbers<[1], [0], [0], [1], [0, 0, 1, 1], [], []>} : vector<8x32xf32>, vector<32x32xf32>, vector<8x32xf32> -> vector<8x32xf32>
    %78 = arith.addf %76, %77 : vector<8x32xf32>
    %79 = math.tanh %78 : vector<8x32xf32>
    %80 = vector.extract_strided_slice %50 {offsets = [0, 0, 0], sizes = [1, 8, 32], strides = [1, 1, 1]} : vector<8x8x32xf32> to vector<1x8x32xf32>
    %81 = vector.shape_cast %80 : vector<1x8x32xf32> to vector<8x32xf32>
    %cst_37 = arith.constant dense<0.000000e+00> : vector<8x32xf32>
    %82 = tpu.matmul %55, %54, %cst_37 {dimension_numbers = #tpu.dot_dimension_numbers<[1], [0], [0], [1], [0, 0, 1, 1], [], []>} : vector<8x32xf32>, vector<32x32xf32>, vector<8x32xf32> -> vector<8x32xf32>
    %83 = arith.addf %81, %82 : vector<8x32xf32>
    %84 = arith.negf %83 : vector<8x32xf32>
    %85 = math.exp %84 : vector<8x32xf32>
    %cst_38 = arith.constant 1.000000e+00 : f32
    %86 = vector.broadcast %cst_38 : f32 to vector<8x32xf32>
    %87 = arith.addf %86, %85 : vector<8x32xf32>
    %88 = arith.divf %86, %87 : vector<8x32xf32>
    %89 = arith.mulf %74, %56 : vector<8x32xf32>
    %90 = arith.mulf %65, %79 : vector<8x32xf32>
    %91 = arith.addf %89, %90 : vector<8x32xf32>
    %92 = math.tanh %91 : vector<8x32xf32>
    %93 = arith.mulf %88, %92 : vector<8x32xf32>
    %94 = vector.extract_strided_slice %44 {offsets = [1, 0, 0], sizes = [1, 8, 32], strides = [1, 1, 1]} : vector<8x8x32xf32> to vector<1x8x32xf32>
    %95 = vector.shape_cast %94 : vector<1x8x32xf32> to vector<8x32xf32>
    %cst_39 = arith.constant dense<0.000000e+00> : vector<8x32xf32>
    %96 = tpu.matmul %93, %51, %cst_39 {dimension_numbers = #tpu.dot_dimension_numbers<[1], [0], [0], [1], [0, 0, 1, 1], [], []>} : vector<8x32xf32>, vector<32x32xf32>, vector<8x32xf32> -> vector<8x32xf32>
    %97 = arith.addf %95, %96 : vector<8x32xf32>
    %98 = arith.negf %97 : vector<8x32xf32>
    %99 = math.exp %98 : vector<8x32xf32>
    %cst_40 = arith.constant 1.000000e+00 : f32
    %100 = vector.broadcast %cst_40 : f32 to vector<8x32xf32>
    %101 = arith.addf %100, %99 : vector<8x32xf32>
    %102 = arith.divf %100, %101 : vector<8x32xf32>
    %103 = vector.extract_strided_slice %46 {offsets = [1, 0, 0], sizes = [1, 8, 32], strides = [1, 1, 1]} : vector<8x8x32xf32> to vector<1x8x32xf32>
    %104 = vector.shape_cast %103 : vector<1x8x32xf32> to vector<8x32xf32>
    %cst_41 = arith.constant dense<0.000000e+00> : vector<8x32xf32>
    %105 = tpu.matmul %93, %52, %cst_41 {dimension_numbers = #tpu.dot_dimension_numbers<[1], [0], [0], [1], [0, 0, 1, 1], [], []>} : vector<8x32xf32>, vector<32x32xf32>, vector<8x32xf32> -> vector<8x32xf32>
    %106 = arith.addf %104, %105 : vector<8x32xf32>
    %107 = arith.negf %106 : vector<8x32xf32>
    %108 = math.exp %107 : vector<8x32xf32>
    %cst_42 = arith.constant 1.000000e+00 : f32
    %109 = vector.broadcast %cst_42 : f32 to vector<8x32xf32>
    %110 = arith.addf %109, %108 : vector<8x32xf32>
    %111 = arith.divf %109, %110 : vector<8x32xf32>
    %112 = vector.extract_strided_slice %48 {offsets = [1, 0, 0], sizes = [1, 8, 32], strides = [1, 1, 1]} : vector<8x8x32xf32> to vector<1x8x32xf32>
    %113 = vector.shape_cast %112 : vector<1x8x32xf32> to vector<8x32xf32>
    %cst_43 = arith.constant dense<0.000000e+00> : vector<8x32xf32>
    %114 = tpu.matmul %93, %53, %cst_43 {dimension_numbers = #tpu.dot_dimension_numbers<[1], [0], [0], [1], [0, 0, 1, 1], [], []>} : vector<8x32xf32>, vector<32x32xf32>, vector<8x32xf32> -> vector<8x32xf32>
    %115 = arith.addf %113, %114 : vector<8x32xf32>
    %116 = math.tanh %115 : vector<8x32xf32>
    %117 = vector.extract_strided_slice %50 {offsets = [1, 0, 0], sizes = [1, 8, 32], strides = [1, 1, 1]} : vector<8x8x32xf32> to vector<1x8x32xf32>
    %118 = vector.shape_cast %117 : vector<1x8x32xf32> to vector<8x32xf32>
    %cst_44 = arith.constant dense<0.000000e+00> : vector<8x32xf32>
    %119 = tpu.matmul %93, %54, %cst_44 {dimension_numbers = #tpu.dot_dimension_numbers<[1], [0], [0], [1], [0, 0, 1, 1], [], []>} : vector<8x32xf32>, vector<32x32xf32>, vector<8x32xf32> -> vector<8x32xf32>
    %120 = arith.addf %118, %119 : vector<8x32xf32>
    %121 = arith.negf %120 : vector<8x32xf32>
    %122 = math.exp %121 : vector<8x32xf32>
    %cst_45 = arith.constant 1.000000e+00 : f32
    %123 = vector.broadcast %cst_45 : f32 to vector<8x32xf32>
    %124 = arith.addf %123, %122 : vector<8x32xf32>
    %125 = arith.divf %123, %124 : vector<8x32xf32>
    %126 = arith.mulf %111, %91 : vector<8x32xf32>
    %127 = arith.mulf %102, %116 : vector<8x32xf32>
    %128 = arith.addf %126, %127 : vector<8x32xf32>
    %129 = math.tanh %128 : vector<8x32xf32>
    %130 = arith.mulf %125, %129 : vector<8x32xf32>
    %131 = vector.extract_strided_slice %44 {offsets = [2, 0, 0], sizes = [1, 8, 32], strides = [1, 1, 1]} : vector<8x8x32xf32> to vector<1x8x32xf32>
    %132 = vector.shape_cast %131 : vector<1x8x32xf32> to vector<8x32xf32>
    %cst_46 = arith.constant dense<0.000000e+00> : vector<8x32xf32>
    %133 = tpu.matmul %130, %51, %cst_46 {dimension_numbers = #tpu.dot_dimension_numbers<[1], [0], [0], [1], [0, 0, 1, 1], [], []>} : vector<8x32xf32>, vector<32x32xf32>, vector<8x32xf32> -> vector<8x32xf32>
    %134 = arith.addf %132, %133 : vector<8x32xf32>
    %135 = arith.negf %134 : vector<8x32xf32>
    %136 = math.exp %135 : vector<8x32xf32>
    %cst_47 = arith.constant 1.000000e+00 : f32
    %137 = vector.broadcast %cst_47 : f32 to vector<8x32xf32>
    %138 = arith.addf %137, %136 : vector<8x32xf32>
    %139 = arith.divf %137, %138 : vector<8x32xf32>
    %140 = vector.extract_strided_slice %46 {offsets = [2, 0, 0], sizes = [1, 8, 32], strides = [1, 1, 1]} : vector<8x8x32xf32> to vector<1x8x32xf32>
    %141 = vector.shape_cast %140 : vector<1x8x32xf32> to vector<8x32xf32>
    %cst_48 = arith.constant dense<0.000000e+00> : vector<8x32xf32>
    %142 = tpu.matmul %130, %52, %cst_48 {dimension_numbers = #tpu.dot_dimension_numbers<[1], [0], [0], [1], [0, 0, 1, 1], [], []>} : vector<8x32xf32>, vector<32x32xf32>, vector<8x32xf32> -> vector<8x32xf32>
    %143 = arith.addf %141, %142 : vector<8x32xf32>
    %144 = arith.negf %143 : vector<8x32xf32>
    %145 = math.exp %144 : vector<8x32xf32>
    %cst_49 = arith.constant 1.000000e+00 : f32
    %146 = vector.broadcast %cst_49 : f32 to vector<8x32xf32>
    %147 = arith.addf %146, %145 : vector<8x32xf32>
    %148 = arith.divf %146, %147 : vector<8x32xf32>
    %149 = vector.extract_strided_slice %48 {offsets = [2, 0, 0], sizes = [1, 8, 32], strides = [1, 1, 1]} : vector<8x8x32xf32> to vector<1x8x32xf32>
    %150 = vector.shape_cast %149 : vector<1x8x32xf32> to vector<8x32xf32>
    %cst_50 = arith.constant dense<0.000000e+00> : vector<8x32xf32>
    %151 = tpu.matmul %130, %53, %cst_50 {dimension_numbers = #tpu.dot_dimension_numbers<[1], [0], [0], [1], [0, 0, 1, 1], [], []>} : vector<8x32xf32>, vector<32x32xf32>, vector<8x32xf32> -> vector<8x32xf32>
    %152 = arith.addf %150, %151 : vector<8x32xf32>
    %153 = math.tanh %152 : vector<8x32xf32>
    %154 = vector.extract_strided_slice %50 {offsets = [2, 0, 0], sizes = [1, 8, 32], strides = [1, 1, 1]} : vector<8x8x32xf32> to vector<1x8x32xf32>
    %155 = vector.shape_cast %154 : vector<1x8x32xf32> to vector<8x32xf32>
    %cst_51 = arith.constant dense<0.000000e+00> : vector<8x32xf32>
    %156 = tpu.matmul %130, %54, %cst_51 {dimension_numbers = #tpu.dot_dimension_numbers<[1], [0], [0], [1], [0, 0, 1, 1], [], []>} : vector<8x32xf32>, vector<32x32xf32>, vector<8x32xf32> -> vector<8x32xf32>
    %157 = arith.addf %155, %156 : vector<8x32xf32>
    %158 = arith.negf %157 : vector<8x32xf32>
    %159 = math.exp %158 : vector<8x32xf32>
    %cst_52 = arith.constant 1.000000e+00 : f32
    %160 = vector.broadcast %cst_52 : f32 to vector<8x32xf32>
    %161 = arith.addf %160, %159 : vector<8x32xf32>
    %162 = arith.divf %160, %161 : vector<8x32xf32>
    %163 = arith.mulf %148, %128 : vector<8x32xf32>
    %164 = arith.mulf %139, %153 : vector<8x32xf32>
    %165 = arith.addf %163, %164 : vector<8x32xf32>
    %166 = math.tanh %165 : vector<8x32xf32>
    %167 = arith.mulf %162, %166 : vector<8x32xf32>
    %168 = vector.extract_strided_slice %44 {offsets = [3, 0, 0], sizes = [1, 8, 32], strides = [1, 1, 1]} : vector<8x8x32xf32> to vector<1x8x32xf32>
    %169 = vector.shape_cast %168 : vector<1x8x32xf32> to vector<8x32xf32>
    %cst_53 = arith.constant dense<0.000000e+00> : vector<8x32xf32>
    %170 = tpu.matmul %167, %51, %cst_53 {dimension_numbers = #tpu.dot_dimension_numbers<[1], [0], [0], [1], [0, 0, 1, 1], [], []>} : vector<8x32xf32>, vector<32x32xf32>, vector<8x32xf32> -> vector<8x32xf32>
    %171 = arith.addf %169, %170 : vector<8x32xf32>
    %172 = arith.negf %171 : vector<8x32xf32>
    %173 = math.exp %172 : vector<8x32xf32>
    %cst_54 = arith.constant 1.000000e+00 : f32
    %174 = vector.broadcast %cst_54 : f32 to vector<8x32xf32>
    %175 = arith.addf %174, %173 : vector<8x32xf32>
    %176 = arith.divf %174, %175 : vector<8x32xf32>
    %177 = vector.extract_strided_slice %46 {offsets = [3, 0, 0], sizes = [1, 8, 32], strides = [1, 1, 1]} : vector<8x8x32xf32> to vector<1x8x32xf32>
    %178 = vector.shape_cast %177 : vector<1x8x32xf32> to vector<8x32xf32>
    %cst_55 = arith.constant dense<0.000000e+00> : vector<8x32xf32>
    %179 = tpu.matmul %167, %52, %cst_55 {dimension_numbers = #tpu.dot_dimension_numbers<[1], [0], [0], [1], [0, 0, 1, 1], [], []>} : vector<8x32xf32>, vector<32x32xf32>, vector<8x32xf32> -> vector<8x32xf32>
    %180 = arith.addf %178, %179 : vector<8x32xf32>
    %181 = arith.negf %180 : vector<8x32xf32>
    %182 = math.exp %181 : vector<8x32xf32>
    %cst_56 = arith.constant 1.000000e+00 : f32
    %183 = vector.broadcast %cst_56 : f32 to vector<8x32xf32>
    %184 = arith.addf %183, %182 : vector<8x32xf32>
    %185 = arith.divf %183, %184 : vector<8x32xf32>
    %186 = vector.extract_strided_slice %48 {offsets = [3, 0, 0], sizes = [1, 8, 32], strides = [1, 1, 1]} : vector<8x8x32xf32> to vector<1x8x32xf32>
    %187 = vector.shape_cast %186 : vector<1x8x32xf32> to vector<8x32xf32>
    %cst_57 = arith.constant dense<0.000000e+00> : vector<8x32xf32>
    %188 = tpu.matmul %167, %53, %cst_57 {dimension_numbers = #tpu.dot_dimension_numbers<[1], [0], [0], [1], [0, 0, 1, 1], [], []>} : vector<8x32xf32>, vector<32x32xf32>, vector<8x32xf32> -> vector<8x32xf32>
    %189 = arith.addf %187, %188 : vector<8x32xf32>
    %190 = math.tanh %189 : vector<8x32xf32>
    %191 = vector.extract_strided_slice %50 {offsets = [3, 0, 0], sizes = [1, 8, 32], strides = [1, 1, 1]} : vector<8x8x32xf32> to vector<1x8x32xf32>
    %192 = vector.shape_cast %191 : vector<1x8x32xf32> to vector<8x32xf32>
    %cst_58 = arith.constant dense<0.000000e+00> : vector<8x32xf32>
    %193 = tpu.matmul %167, %54, %cst_58 {dimension_numbers = #tpu.dot_dimension_numbers<[1], [0], [0], [1], [0, 0, 1, 1], [], []>} : vector<8x32xf32>, vector<32x32xf32>, vector<8x32xf32> -> vector<8x32xf32>
    %194 = arith.addf %192, %193 : vector<8x32xf32>
    %195 = arith.negf %194 : vector<8x32xf32>
    %196 = math.exp %195 : vector<8x32xf32>
    %cst_59 = arith.constant 1.000000e+00 : f32
    %197 = vector.broadcast %cst_59 : f32 to vector<8x32xf32>
    %198 = arith.addf %197, %196 : vector<8x32xf32>
    %199 = arith.divf %197, %198 : vector<8x32xf32>
    %200 = arith.mulf %185, %165 : vector<8x32xf32>
    %201 = arith.mulf %176, %190 : vector<8x32xf32>
    %202 = arith.addf %200, %201 : vector<8x32xf32>
    %203 = math.tanh %202 : vector<8x32xf32>
    %204 = arith.mulf %199, %203 : vector<8x32xf32>
    %205 = vector.extract_strided_slice %44 {offsets = [4, 0, 0], sizes = [1, 8, 32], strides = [1, 1, 1]} : vector<8x8x32xf32> to vector<1x8x32xf32>
    %206 = vector.shape_cast %205 : vector<1x8x32xf32> to vector<8x32xf32>
    %cst_60 = arith.constant dense<0.000000e+00> : vector<8x32xf32>
    %207 = tpu.matmul %204, %51, %cst_60 {dimension_numbers = #tpu.dot_dimension_numbers<[1], [0], [0], [1], [0, 0, 1, 1], [], []>} : vector<8x32xf32>, vector<32x32xf32>, vector<8x32xf32> -> vector<8x32xf32>
    %208 = arith.addf %206, %207 : vector<8x32xf32>
    %209 = arith.negf %208 : vector<8x32xf32>
    %210 = math.exp %209 : vector<8x32xf32>
    %cst_61 = arith.constant 1.000000e+00 : f32
    %211 = vector.broadcast %cst_61 : f32 to vector<8x32xf32>
    %212 = arith.addf %211, %210 : vector<8x32xf32>
    %213 = arith.divf %211, %212 : vector<8x32xf32>
    %214 = vector.extract_strided_slice %46 {offsets = [4, 0, 0], sizes = [1, 8, 32], strides = [1, 1, 1]} : vector<8x8x32xf32> to vector<1x8x32xf32>
    %215 = vector.shape_cast %214 : vector<1x8x32xf32> to vector<8x32xf32>
    %cst_62 = arith.constant dense<0.000000e+00> : vector<8x32xf32>
    %216 = tpu.matmul %204, %52, %cst_62 {dimension_numbers = #tpu.dot_dimension_numbers<[1], [0], [0], [1], [0, 0, 1, 1], [], []>} : vector<8x32xf32>, vector<32x32xf32>, vector<8x32xf32> -> vector<8x32xf32>
    %217 = arith.addf %215, %216 : vector<8x32xf32>
    %218 = arith.negf %217 : vector<8x32xf32>
    %219 = math.exp %218 : vector<8x32xf32>
    %cst_63 = arith.constant 1.000000e+00 : f32
    %220 = vector.broadcast %cst_63 : f32 to vector<8x32xf32>
    %221 = arith.addf %220, %219 : vector<8x32xf32>
    %222 = arith.divf %220, %221 : vector<8x32xf32>
    %223 = vector.extract_strided_slice %48 {offsets = [4, 0, 0], sizes = [1, 8, 32], strides = [1, 1, 1]} : vector<8x8x32xf32> to vector<1x8x32xf32>
    %224 = vector.shape_cast %223 : vector<1x8x32xf32> to vector<8x32xf32>
    %cst_64 = arith.constant dense<0.000000e+00> : vector<8x32xf32>
    %225 = tpu.matmul %204, %53, %cst_64 {dimension_numbers = #tpu.dot_dimension_numbers<[1], [0], [0], [1], [0, 0, 1, 1], [], []>} : vector<8x32xf32>, vector<32x32xf32>, vector<8x32xf32> -> vector<8x32xf32>
    %226 = arith.addf %224, %225 : vector<8x32xf32>
    %227 = math.tanh %226 : vector<8x32xf32>
    %228 = vector.extract_strided_slice %50 {offsets = [4, 0, 0], sizes = [1, 8, 32], strides = [1, 1, 1]} : vector<8x8x32xf32> to vector<1x8x32xf32>
    %229 = vector.shape_cast %228 : vector<1x8x32xf32> to vector<8x32xf32>
    %cst_65 = arith.constant dense<0.000000e+00> : vector<8x32xf32>
    %230 = tpu.matmul %204, %54, %cst_65 {dimension_numbers = #tpu.dot_dimension_numbers<[1], [0], [0], [1], [0, 0, 1, 1], [], []>} : vector<8x32xf32>, vector<32x32xf32>, vector<8x32xf32> -> vector<8x32xf32>
    %231 = arith.addf %229, %230 : vector<8x32xf32>
    %232 = arith.negf %231 : vector<8x32xf32>
    %233 = math.exp %232 : vector<8x32xf32>
    %cst_66 = arith.constant 1.000000e+00 : f32
    %234 = vector.broadcast %cst_66 : f32 to vector<8x32xf32>
    %235 = arith.addf %234, %233 : vector<8x32xf32>
    %236 = arith.divf %234, %235 : vector<8x32xf32>
    %237 = arith.mulf %222, %202 : vector<8x32xf32>
    %238 = arith.mulf %213, %227 : vector<8x32xf32>
    %239 = arith.addf %237, %238 : vector<8x32xf32>
    %240 = math.tanh %239 : vector<8x32xf32>
    %241 = arith.mulf %236, %240 : vector<8x32xf32>
    %242 = vector.extract_strided_slice %44 {offsets = [5, 0, 0], sizes = [1, 8, 32], strides = [1, 1, 1]} : vector<8x8x32xf32> to vector<1x8x32xf32>
    %243 = vector.shape_cast %242 : vector<1x8x32xf32> to vector<8x32xf32>
    %cst_67 = arith.constant dense<0.000000e+00> : vector<8x32xf32>
    %244 = tpu.matmul %241, %51, %cst_67 {dimension_numbers = #tpu.dot_dimension_numbers<[1], [0], [0], [1], [0, 0, 1, 1], [], []>} : vector<8x32xf32>, vector<32x32xf32>, vector<8x32xf32> -> vector<8x32xf32>
    %245 = arith.addf %243, %244 : vector<8x32xf32>
    %246 = arith.negf %245 : vector<8x32xf32>
    %247 = math.exp %246 : vector<8x32xf32>
    %cst_68 = arith.constant 1.000000e+00 : f32
    %248 = vector.broadcast %cst_68 : f32 to vector<8x32xf32>
    %249 = arith.addf %248, %247 : vector<8x32xf32>
    %250 = arith.divf %248, %249 : vector<8x32xf32>
    %251 = vector.extract_strided_slice %46 {offsets = [5, 0, 0], sizes = [1, 8, 32], strides = [1, 1, 1]} : vector<8x8x32xf32> to vector<1x8x32xf32>
    %252 = vector.shape_cast %251 : vector<1x8x32xf32> to vector<8x32xf32>
    %cst_69 = arith.constant dense<0.000000e+00> : vector<8x32xf32>
    %253 = tpu.matmul %241, %52, %cst_69 {dimension_numbers = #tpu.dot_dimension_numbers<[1], [0], [0], [1], [0, 0, 1, 1], [], []>} : vector<8x32xf32>, vector<32x32xf32>, vector<8x32xf32> -> vector<8x32xf32>
    %254 = arith.addf %252, %253 : vector<8x32xf32>
    %255 = arith.negf %254 : vector<8x32xf32>
    %256 = math.exp %255 : vector<8x32xf32>
    %cst_70 = arith.constant 1.000000e+00 : f32
    %257 = vector.broadcast %cst_70 : f32 to vector<8x32xf32>
    %258 = arith.addf %257, %256 : vector<8x32xf32>
    %259 = arith.divf %257, %258 : vector<8x32xf32>
    %260 = vector.extract_strided_slice %48 {offsets = [5, 0, 0], sizes = [1, 8, 32], strides = [1, 1, 1]} : vector<8x8x32xf32> to vector<1x8x32xf32>
    %261 = vector.shape_cast %260 : vector<1x8x32xf32> to vector<8x32xf32>
    %cst_71 = arith.constant dense<0.000000e+00> : vector<8x32xf32>
    %262 = tpu.matmul %241, %53, %cst_71 {dimension_numbers = #tpu.dot_dimension_numbers<[1], [0], [0], [1], [0, 0, 1, 1], [], []>} : vector<8x32xf32>, vector<32x32xf32>, vector<8x32xf32> -> vector<8x32xf32>
    %263 = arith.addf %261, %262 : vector<8x32xf32>
    %264 = math.tanh %263 : vector<8x32xf32>
    %265 = vector.extract_strided_slice %50 {offsets = [5, 0, 0], sizes = [1, 8, 32], strides = [1, 1, 1]} : vector<8x8x32xf32> to vector<1x8x32xf32>
    %266 = vector.shape_cast %265 : vector<1x8x32xf32> to vector<8x32xf32>
    %cst_72 = arith.constant dense<0.000000e+00> : vector<8x32xf32>
    %267 = tpu.matmul %241, %54, %cst_72 {dimension_numbers = #tpu.dot_dimension_numbers<[1], [0], [0], [1], [0, 0, 1, 1], [], []>} : vector<8x32xf32>, vector<32x32xf32>, vector<8x32xf32> -> vector<8x32xf32>
    %268 = arith.addf %266, %267 : vector<8x32xf32>
    %269 = arith.negf %268 : vector<8x32xf32>
    %270 = math.exp %269 : vector<8x32xf32>
    %cst_73 = arith.constant 1.000000e+00 : f32
    %271 = vector.broadcast %cst_73 : f32 to vector<8x32xf32>
    %272 = arith.addf %271, %270 : vector<8x32xf32>
    %273 = arith.divf %271, %272 : vector<8x32xf32>
    %274 = arith.mulf %259, %239 : vector<8x32xf32>
    %275 = arith.mulf %250, %264 : vector<8x32xf32>
    %276 = arith.addf %274, %275 : vector<8x32xf32>
    %277 = math.tanh %276 : vector<8x32xf32>
    %278 = arith.mulf %273, %277 : vector<8x32xf32>
    %279 = vector.extract_strided_slice %44 {offsets = [6, 0, 0], sizes = [1, 8, 32], strides = [1, 1, 1]} : vector<8x8x32xf32> to vector<1x8x32xf32>
    %280 = vector.shape_cast %279 : vector<1x8x32xf32> to vector<8x32xf32>
    %cst_74 = arith.constant dense<0.000000e+00> : vector<8x32xf32>
    %281 = tpu.matmul %278, %51, %cst_74 {dimension_numbers = #tpu.dot_dimension_numbers<[1], [0], [0], [1], [0, 0, 1, 1], [], []>} : vector<8x32xf32>, vector<32x32xf32>, vector<8x32xf32> -> vector<8x32xf32>
    %282 = arith.addf %280, %281 : vector<8x32xf32>
    %283 = arith.negf %282 : vector<8x32xf32>
    %284 = math.exp %283 : vector<8x32xf32>
    %cst_75 = arith.constant 1.000000e+00 : f32
    %285 = vector.broadcast %cst_75 : f32 to vector<8x32xf32>
    %286 = arith.addf %285, %284 : vector<8x32xf32>
    %287 = arith.divf %285, %286 : vector<8x32xf32>
    %288 = vector.extract_strided_slice %46 {offsets = [6, 0, 0], sizes = [1, 8, 32], strides = [1, 1, 1]} : vector<8x8x32xf32> to vector<1x8x32xf32>
    %289 = vector.shape_cast %288 : vector<1x8x32xf32> to vector<8x32xf32>
    %cst_76 = arith.constant dense<0.000000e+00> : vector<8x32xf32>
    %290 = tpu.matmul %278, %52, %cst_76 {dimension_numbers = #tpu.dot_dimension_numbers<[1], [0], [0], [1], [0, 0, 1, 1], [], []>} : vector<8x32xf32>, vector<32x32xf32>, vector<8x32xf32> -> vector<8x32xf32>
    %291 = arith.addf %289, %290 : vector<8x32xf32>
    %292 = arith.negf %291 : vector<8x32xf32>
    %293 = math.exp %292 : vector<8x32xf32>
    %cst_77 = arith.constant 1.000000e+00 : f32
    %294 = vector.broadcast %cst_77 : f32 to vector<8x32xf32>
    %295 = arith.addf %294, %293 : vector<8x32xf32>
    %296 = arith.divf %294, %295 : vector<8x32xf32>
    %297 = vector.extract_strided_slice %48 {offsets = [6, 0, 0], sizes = [1, 8, 32], strides = [1, 1, 1]} : vector<8x8x32xf32> to vector<1x8x32xf32>
    %298 = vector.shape_cast %297 : vector<1x8x32xf32> to vector<8x32xf32>
    %cst_78 = arith.constant dense<0.000000e+00> : vector<8x32xf32>
    %299 = tpu.matmul %278, %53, %cst_78 {dimension_numbers = #tpu.dot_dimension_numbers<[1], [0], [0], [1], [0, 0, 1, 1], [], []>} : vector<8x32xf32>, vector<32x32xf32>, vector<8x32xf32> -> vector<8x32xf32>
    %300 = arith.addf %298, %299 : vector<8x32xf32>
    %301 = math.tanh %300 : vector<8x32xf32>
    %302 = vector.extract_strided_slice %50 {offsets = [6, 0, 0], sizes = [1, 8, 32], strides = [1, 1, 1]} : vector<8x8x32xf32> to vector<1x8x32xf32>
    %303 = vector.shape_cast %302 : vector<1x8x32xf32> to vector<8x32xf32>
    %cst_79 = arith.constant dense<0.000000e+00> : vector<8x32xf32>
    %304 = tpu.matmul %278, %54, %cst_79 {dimension_numbers = #tpu.dot_dimension_numbers<[1], [0], [0], [1], [0, 0, 1, 1], [], []>} : vector<8x32xf32>, vector<32x32xf32>, vector<8x32xf32> -> vector<8x32xf32>
    %305 = arith.addf %303, %304 : vector<8x32xf32>
    %306 = arith.negf %305 : vector<8x32xf32>
    %307 = math.exp %306 : vector<8x32xf32>
    %cst_80 = arith.constant 1.000000e+00 : f32
    %308 = vector.broadcast %cst_80 : f32 to vector<8x32xf32>
    %309 = arith.addf %308, %307 : vector<8x32xf32>
    %310 = arith.divf %308, %309 : vector<8x32xf32>
    %311 = arith.mulf %296, %276 : vector<8x32xf32>
    %312 = arith.mulf %287, %301 : vector<8x32xf32>
    %313 = arith.addf %311, %312 : vector<8x32xf32>
    %314 = math.tanh %313 : vector<8x32xf32>
    %315 = arith.mulf %310, %314 : vector<8x32xf32>
    %316 = vector.extract_strided_slice %44 {offsets = [7, 0, 0], sizes = [1, 8, 32], strides = [1, 1, 1]} : vector<8x8x32xf32> to vector<1x8x32xf32>
    %317 = vector.shape_cast %316 : vector<1x8x32xf32> to vector<8x32xf32>
    %cst_81 = arith.constant dense<0.000000e+00> : vector<8x32xf32>
    %318 = tpu.matmul %315, %51, %cst_81 {dimension_numbers = #tpu.dot_dimension_numbers<[1], [0], [0], [1], [0, 0, 1, 1], [], []>} : vector<8x32xf32>, vector<32x32xf32>, vector<8x32xf32> -> vector<8x32xf32>
    %319 = arith.addf %317, %318 : vector<8x32xf32>
    %320 = arith.negf %319 : vector<8x32xf32>
    %321 = math.exp %320 : vector<8x32xf32>
    %cst_82 = arith.constant 1.000000e+00 : f32
    %322 = vector.broadcast %cst_82 : f32 to vector<8x32xf32>
    %323 = arith.addf %322, %321 : vector<8x32xf32>
    %324 = arith.divf %322, %323 : vector<8x32xf32>
    %325 = vector.extract_strided_slice %46 {offsets = [7, 0, 0], sizes = [1, 8, 32], strides = [1, 1, 1]} : vector<8x8x32xf32> to vector<1x8x32xf32>
    %326 = vector.shape_cast %325 : vector<1x8x32xf32> to vector<8x32xf32>
    %cst_83 = arith.constant dense<0.000000e+00> : vector<8x32xf32>
    %327 = tpu.matmul %315, %52, %cst_83 {dimension_numbers = #tpu.dot_dimension_numbers<[1], [0], [0], [1], [0, 0, 1, 1], [], []>} : vector<8x32xf32>, vector<32x32xf32>, vector<8x32xf32> -> vector<8x32xf32>
    %328 = arith.addf %326, %327 : vector<8x32xf32>
    %329 = arith.negf %328 : vector<8x32xf32>
    %330 = math.exp %329 : vector<8x32xf32>
    %cst_84 = arith.constant 1.000000e+00 : f32
    %331 = vector.broadcast %cst_84 : f32 to vector<8x32xf32>
    %332 = arith.addf %331, %330 : vector<8x32xf32>
    %333 = arith.divf %331, %332 : vector<8x32xf32>
    %334 = vector.extract_strided_slice %48 {offsets = [7, 0, 0], sizes = [1, 8, 32], strides = [1, 1, 1]} : vector<8x8x32xf32> to vector<1x8x32xf32>
    %335 = vector.shape_cast %334 : vector<1x8x32xf32> to vector<8x32xf32>
    %cst_85 = arith.constant dense<0.000000e+00> : vector<8x32xf32>
    %336 = tpu.matmul %315, %53, %cst_85 {dimension_numbers = #tpu.dot_dimension_numbers<[1], [0], [0], [1], [0, 0, 1, 1], [], []>} : vector<8x32xf32>, vector<32x32xf32>, vector<8x32xf32> -> vector<8x32xf32>
    %337 = arith.addf %335, %336 : vector<8x32xf32>
    %338 = math.tanh %337 : vector<8x32xf32>
    %339 = vector.extract_strided_slice %50 {offsets = [7, 0, 0], sizes = [1, 8, 32], strides = [1, 1, 1]} : vector<8x8x32xf32> to vector<1x8x32xf32>
    %340 = vector.shape_cast %339 : vector<1x8x32xf32> to vector<8x32xf32>
    %cst_86 = arith.constant dense<0.000000e+00> : vector<8x32xf32>
    %341 = tpu.matmul %315, %54, %cst_86 {dimension_numbers = #tpu.dot_dimension_numbers<[1], [0], [0], [1], [0, 0, 1, 1], [], []>} : vector<8x32xf32>, vector<32x32xf32>, vector<8x32xf32> -> vector<8x32xf32>
    %342 = arith.addf %340, %341 : vector<8x32xf32>
    %343 = arith.negf %342 : vector<8x32xf32>
    %344 = math.exp %343 : vector<8x32xf32>
    %cst_87 = arith.constant 1.000000e+00 : f32
    %345 = vector.broadcast %cst_87 : f32 to vector<8x32xf32>
    %346 = arith.addf %345, %344 : vector<8x32xf32>
    %347 = arith.divf %345, %346 : vector<8x32xf32>
    %348 = arith.mulf %333, %313 : vector<8x32xf32>
    %349 = arith.mulf %324, %338 : vector<8x32xf32>
    %350 = arith.addf %348, %349 : vector<8x32xf32>
    %351 = math.tanh %350 : vector<8x32xf32>
    %352 = arith.mulf %347, %351 : vector<8x32xf32>
    %c0_88 = arith.constant 0 : index
    %c0_89 = arith.constant 0 : index
    %353 = vector.load %arg11[%c0_88, %c0_89] : memref<32x32xf32, #tpu.memory_space<vmem>>, vector<32x32xf32>
    %cst_90 = arith.constant dense<0.000000e+00> : vector<8x32xf32>
    %354 = tpu.matmul %352, %353, %cst_90 {dimension_numbers = #tpu.dot_dimension_numbers<[1], [0], [0], [1], [0, 0, 1, 1], [], []>} : vector<8x32xf32>, vector<32x32xf32>, vector<8x32xf32> -> vector<8x32xf32>
    %c0_91 = arith.constant 0 : index
    %c0_92 = arith.constant 0 : index
    %355 = vector.load %arg12[%c0_91, %c0_92] : memref<1x32xf32, #tpu.memory_space<vmem>>, vector<1x32xf32>
    %356 = vector.broadcast %355 : vector<1x32xf32> to vector<8x32xf32>
    %357 = arith.addf %354, %356 : vector<8x32xf32>
    %c0_93 = arith.constant 0 : index
    %c0_94 = arith.constant 0 : index
    %358 = vector.load %arg13[%c0_93, %c0_94] : memref<1x32xf32, #tpu.memory_space<vmem>>, vector<1x32xf32>
    %c0_95 = arith.constant 0 : index
    %c0_96 = arith.constant 0 : index
    %359 = vector.load %arg14[%c0_95, %c0_96] : memref<1x32xf32, #tpu.memory_space<vmem>>, vector<1x32xf32>
    %cst_97 = arith.constant dense<0.000000e+00> : vector<8xf32>
    %360 = vector.multi_reduction <add>, %357, %cst_97 [1] : vector<8x32xf32> to vector<8xf32>
    %361 = vector.shape_cast %360 : vector<8xf32> to vector<8x1xf32>
    %cst_98 = arith.constant 3.200000e+01 : f32
    %362 = vector.broadcast %cst_98 : f32 to vector<8x1xf32>
    %363 = arith.divf %361, %362 : vector<8x1xf32>
    %364 = vector.broadcast %363 : vector<8x1xf32> to vector<8x32xf32>
    %365 = arith.subf %357, %364 : vector<8x32xf32>
    %366 = arith.mulf %365, %365 : vector<8x32xf32>
    %cst_99 = arith.constant dense<0.000000e+00> : vector<8xf32>
    %367 = vector.multi_reduction <add>, %366, %cst_99 [1] : vector<8x32xf32> to vector<8xf32>
    %368 = vector.shape_cast %367 : vector<8xf32> to vector<8x1xf32>
    %cst_100 = arith.constant 3.200000e+01 : f32
    %369 = vector.broadcast %cst_100 : f32 to vector<8x1xf32>
    %370 = arith.divf %368, %369 : vector<8x1xf32>
    %371 = vector.broadcast %363 : vector<8x1xf32> to vector<8x32xf32>
    %372 = arith.subf %357, %371 : vector<8x32xf32>
    %cst_101 = arith.constant 9.99999974E-6 : f32
    %373 = vector.broadcast %cst_101 : f32 to vector<8x1xf32>
    %374 = arith.addf %370, %373 : vector<8x1xf32>
    %375 = math.rsqrt %374 : vector<8x1xf32>
    %376 = vector.broadcast %375 : vector<8x1xf32> to vector<8x32xf32>
    %377 = arith.mulf %372, %376 : vector<8x32xf32>
    %378 = vector.broadcast %358 : vector<1x32xf32> to vector<8x32xf32>
    %379 = arith.mulf %377, %378 : vector<8x32xf32>
    %380 = vector.broadcast %359 : vector<1x32xf32> to vector<8x32xf32>
    %381 = arith.addf %379, %380 : vector<8x32xf32>
    %cst_102 = arith.constant 5.000000e-01 : f32
    %382 = vector.broadcast %cst_102 : f32 to vector<8x32xf32>
    %383 = arith.mulf %382, %381 : vector<8x32xf32>
    %cst_103 = arith.constant 0.707106769 : f32
    %384 = vector.broadcast %cst_103 : f32 to vector<8x32xf32>
    %385 = arith.mulf %381, %384 : vector<8x32xf32>
    %386 = math.erf %385 : vector<8x32xf32>
    %cst_104 = arith.constant 1.000000e+00 : f32
    %387 = vector.broadcast %cst_104 : f32 to vector<8x32xf32>
    %388 = arith.addf %387, %386 : vector<8x32xf32>
    %389 = arith.mulf %383, %388 : vector<8x32xf32>
    %c0_105 = arith.constant 0 : index
    %c0_106 = arith.constant 0 : index
    %390 = vector.load %arg15[%c0_105, %c0_106] : memref<32x4xf32, #tpu.memory_space<vmem>>, vector<32x4xf32>
    %cst_107 = arith.constant dense<0.000000e+00> : vector<8x4xf32>
    %391 = tpu.matmul %389, %390, %cst_107 {dimension_numbers = #tpu.dot_dimension_numbers<[1], [0], [0], [1], [0, 0, 1, 1], [], []>} : vector<8x32xf32>, vector<32x4xf32>, vector<8x4xf32> -> vector<8x4xf32>
    %c0_108 = arith.constant 0 : index
    %c0_109 = arith.constant 0 : index
    %392 = vector.load %arg16[%c0_108, %c0_109] : memref<1x4xf32, #tpu.memory_space<vmem>>, vector<1x4xf32>
    %393 = vector.broadcast %392 : vector<1x4xf32> to vector<8x4xf32>
    %394 = arith.addf %391, %393 : vector<8x4xf32>
    %c0_110 = arith.constant 0 : index
    %c0_111 = arith.constant 0 : index
    %395 = vector.load %arg17[%c0_110, %c0_111] : memref<8x4xf32, #tpu.memory_space<vmem>>, vector<8x4xf32>
    tpu.vector_store %arg17[%c0_110, %c0_111], %394 {strides = array<i32>} : memref<8x4xf32, #tpu.memory_space<vmem>>, vector<8x4xf32>,
    return
  }
}

</mosaic_0001>

<bundles_post_ra>
// kernel: tpu_custom_call.1
= control target key start
LH: loop header
LB: loop body
LE: loop exit
PB: predicated region body
PF: predicated region fallthrough
CT: control target
= control target key end

     0   :  { %s5456_s0 = inlined_call_operand.vmem [shape: f32[64,4], index: 0, kind: input, shape index: {}]   ;;  %s5457_s1 = inlined_call_operand.hbm [shape: f32[4,32], index: 1, kind: input, shape index: {}]   ;;  %s5458_s2 = inlined_call_operand.vmem [shape: f32[1,32], index: 2, kind: input, shape index: {}]   ;;  %s5459_s3 = inlined_call_operand.vmem [shape: f32[1,32], index: 3, kind: input, shape index: {}]   ;;  %s5460_s4 = inlined_call_operand.hbm [shape: f32[1,32], index: 4, kind: input, shape index: {}]   ;;  %s5461_s5 = inlined_call_operand.vmem [shape: f32[32,128], index: 5, kind: input, shape index: {}]   ;;  %s5462_s6 = inlined_call_operand.hbm [shape: f32[1,128], index: 6, kind: input, shape index: {}]   ;;  %s5463_s7 = inlined_call_operand.vmem [shape: f32[32,32], index: 7, kind: input, shape index: {}]   ;;  %s5464_s8 = inlined_call_operand.vmem [shape: f32[32,32], index: 8, kind: input, shape index: {}]   ;;  %s5465_s9 = inlined_call_operand.vmem [shape: f32[32,32], index: 9, kind: input, shape index: {}]   ;;  %s5466_s10 = inlined_call_operand.hbm [shape: f32[32,32], index: 10, kind: input, shape index: {}]   ;;  %s5467_s11 = inlined_call_operand.hbm [shape: f32[32,32], index: 11, kind: input, shape index: {}]   ;;  %s5468_s12 = inlined_call_operand.vmem [shape: f32[1,32], index: 12, kind: input, shape index: {}]   ;;  %s5469_s13 = inlined_call_operand.vmem [shape: f32[1,32], index: 13, kind: input, shape index: {}]   ;;  %s5470_s14 = inlined_call_operand.vmem [shape: f32[1,32], index: 14, kind: input, shape index: {}]   ;;  %s5471_s15 = inlined_call_operand.vmem [shape: f32[32,4], index: 15, kind: input, shape index: {}]   ;;  %s5472_s16 = inlined_call_operand.vmem [shape: f32[1,4], index: 16, kind: input, shape index: {}]   ;;  %s5473_s17 = inlined_call_operand.vmem [shape: f32[8,4], index: 17, kind: output, shape index: {}]  }
   0x1   :  { %5476 = sst [smem:[#allocation13_spill]] %s5456_s0 }
   0x2   :  { %5477 = sst [smem:[#allocation14_spill]] %s5457_s1 }
   0x3   :  { %5478 = sst [smem:[#allocation15_spill]] %s5473_s17 }
   0x4   :  { %22 = vsyncpa [#allocation3], 0 }
   0x5   :  { %23 = vsyncpa [#allocation5], 0 }
   0x6   :  { %24 = vsyncpa [#allocation8], 0  ;;  %s4689_s24 = smov [#allocation4]   ;;  %s4690_s26 = smov [#allocation7]  }
   0x7   :  { %s47_s25 = sshll.u32 %s4689_s24, 4  ;;  %s74_s27 = sshll.u32 %s4690_s26, 4  ;;  %s48_s25 = int_to_ptr.vmem [resolvable:$true] %s47_s25  ;;  %s4792_s27 = int_to_ptr.vmem [resolvable:$true] %s74_s27 }
   0x8   :  { %s4573_s0 = scalar_lea.hbm %s5460_s4, 16 }
   0x9   :  { %p4574_p0 = scmp.ne.s32.totalorder %s5460_s4, %s4573_s0  ;;  %p4577_p1 = scmp.lt.u32.totalorder %s4573_s0, %s5460_s4 }
   0xb   :  { %p4579_p2 = pnand %p4577_p1, %p4574_p0 }
   0xd   :  { %4582 = shalt.err (!%p4579_p2)
}
   0xe   :  { %s4583_s20 = scalar_lea.vmem %s48_s25, 16  ;;  %s4587_s21 = scalar_lea.vmem %s48_s25, 32 }
   0xf   :  { %p4584_p3 = scmp.ne.s32.totalorder %s48_s25, %s4583_s20  ;;  %p4588_p4 = scmp.lt.s32.totalorder %s48_s25, %s48_s25 }
  0x10   :  { %p4589_p5 = scmp.lt.s32.totalorder %s4587_s21, %s4583_s20 }
  0x12   :  { %p4590_p6 = por %p4589_p5, %p4588_p4 }
  0x14   :  { %p4591_p7 = pnand %p4590_p6, %p4584_p3 }
  0x16   :  { %4594 = shalt.err (!%p4591_p7)
}
  0x17   :  { %50 = dma.hbm_to_vmem [thread:$0]  %s5460_s4, 16, %s48_s25, [#allocation5]  }
  0x18   :  { %s4595_s28 = scalar_lea.hbm %s5466_s10, 512 }
  0x19   :  { %p4596_p8 = scmp.ne.s32.totalorder %s5466_s10, %s4595_s28  ;;  %p4599_p9 = scmp.lt.u32.totalorder %s4595_s28, %s5466_s10 }
  0x1b   :  { %p4601_p10 = pnand %p4599_p9, %p4596_p8 }
  0x1d   :  { %4604 = shalt.err (!%p4601_p10)
}
  0x1e   :  { %s4605_s19 = scalar_lea.vmem %s4792_s27, 512  ;;  %p4610_p12 = scmp.lt.s32.totalorder %s4792_s27, %s4792_s27 }
  0x1f   :  { %p4606_p11 = scmp.ne.s32.totalorder %s4792_s27, %s4605_s19  ;;  %p4611_p13 = scmp.lt.s32.totalorder %s4605_s19, %s4605_s19 }
  0x21   :  { %p4612_p0 = por %p4611_p13, %p4610_p12 }
  0x23   :  { %p4613_p1 = pnand %p4612_p0, %p4606_p11 }
  0x25   :  { %4616 = shalt.err (!%p4613_p1)
}
  0x26   :  { %s4691_s4 = smov 128   ;;  %s4692_s25 = smov 8  }
  0x27   :  { %80 = dma.hbm_to_vmem [thread:$0]  %s5466_s10, 512, %s4792_s27, [#allocation8], %s4691_s4, %s4691_s4, %s4692_s25  }
  0x28   :  { %s4693_s21 = smov [#allocation2]   ;;  %s4694_s23 = smov [#allocation6]  }
  0x29   :  { %s33_s22 = sshll.u32 %s4693_s21, 4  ;;  %s59_s24 = sshll.u32 %s4694_s23, 4  ;;  %s34_s22 = int_to_ptr.vmem [resolvable:$true] %s33_s22  ;;  %s60_s24 = int_to_ptr.vmem [resolvable:$true] %s59_s24 }
  0x2a   :  { %s5479_s29 = sld [smem:[#allocation14_spill]] }
  0x30   :  { %s4617_s0 = scalar_lea.hbm %s5479_s29, 64 }
  0x31   :  { %p4618_p2 = scmp.ne.s32.totalorder %s5479_s29, %s4617_s0  ;;  %p4621_p3 = scmp.lt.u32.totalorder %s4617_s0, %s5479_s29 }
  0x33   :  { %p4623_p4 = pnand %p4621_p3, %p4618_p2 }
  0x35   :  { %4626 = shalt.err (!%p4623_p4)
}
  0x36   :  { %s4627_s10 = scalar_lea.vmem %s34_s22, 64  ;;  %p4632_p6 = scmp.lt.s32.totalorder %s34_s22, %s34_s22 }
  0x37   :  { %p4628_p5 = scmp.ne.s32.totalorder %s34_s22, %s4627_s10  ;;  %p4633_p7 = scmp.lt.s32.totalorder %s4627_s10, %s4627_s10 }
  0x39   :  { %p4634_p8 = por %p4633_p7, %p4632_p6 }
  0x3b   :  { %p4635_p9 = pnand %p4634_p8, %p4628_p5 }
  0x3d   :  { %4638 = shalt.err (!%p4635_p9)
}
  0x3e   :  { %36 = dma.hbm_to_vmem [thread:$0]  %s5479_s29, 64, %s34_s22, [#allocation3]  }
  0x3f   :  { %s4639_s23 = scalar_lea.hbm %s5462_s6, 16 }
  0x40   :  { %p4640_p10 = scmp.ne.s32.totalorder %s5462_s6, %s4639_s23  ;;  %p4643_p11 = scmp.lt.u32.totalorder %s4639_s23, %s5462_s6 }
  0x42   :  { %p4645_p12 = pnand %p4643_p11, %p4640_p10 }
  0x44   :  { %4648 = shalt.err (!%p4645_p12)
}
  0x45   :  { %s4649_s30 = scalar_lea.vmem %s60_s24, 16  ;;  %s4653_s18 = scalar_lea.vmem %s60_s24, 32 }
  0x46   :  { %p4650_p13 = scmp.ne.s32.totalorder %s60_s24, %s4649_s30  ;;  %p4654_p0 = scmp.lt.s32.totalorder %s60_s24, %s60_s24 }
  0x47   :  { %p4655_p1 = scmp.lt.s32.totalorder %s4653_s18, %s4649_s30 }
  0x49   :  { %p4656_p2 = por %p4655_p1, %p4654_p0 }
  0x4b   :  { %p4657_p3 = pnand %p4656_p2, %p4650_p13 }
  0x4d   :  { %4660 = shalt.err (!%p4657_p3)
}
  0x4e   :  { %62 = dma.hbm_to_vmem [thread:$0]  %s5462_s6, 16, %s60_s24, [#allocation5]  }
  0x4f   :  { %s4695_s19 = smov [#allocation9]   ;;  %s4661_s20 = scalar_lea.hbm %s5467_s11, 512 }
  0x50   :  { %s86_s10 = sshll.u32 %s4695_s19, 4  ;;  %p4662_p4 = scmp.ne.s32.totalorder %s5467_s11, %s4661_s20  ;;  %s87_s10 = int_to_ptr.vmem [resolvable:$true] %s86_s10 }
  0x51   :  { %p4665_p5 = scmp.lt.u32.totalorder %s4661_s20, %s5467_s11 }
  0x53   :  { %p4667_p6 = pnand %p4665_p5, %p4662_p4 }
  0x55   :  { %4670 = shalt.err (!%p4667_p6)
}
  0x56   :  { %s4671_s28 = scalar_lea.vmem %s87_s10, 512  ;;  %p4676_p8 = scmp.lt.s32.totalorder %s87_s10, %s87_s10 }
  0x57   :  { %p4672_p7 = scmp.ne.s32.totalorder %s87_s10, %s4671_s28  ;;  %p4677_p9 = scmp.lt.s32.totalorder %s4671_s28, %s4671_s28 }
  0x59   :  { %p4678_p10 = por %p4677_p9, %p4676_p8 }
  0x5b   :  { %p4679_p11 = pnand %p4678_p10, %p4672_p7 }
  0x5d   :  { %4682 = shalt.err (!%p4679_p11)
}
  0x5e   :  { %92 = dma.hbm_to_vmem [thread:$0]  %s5467_s11, 512, %s87_s10, [#allocation8], %s4691_s4, %s4691_s4, %s4692_s25  }
  0x5f   :  { %4683 = dma.done.wait [#allocation3], 64  }
  0x60   :  { %4684 = vsyncadd [#allocation3], 4294967232 }
  0x61   :  { %4685 = dma.done.wait [#allocation5], 32  }
  0x62   :  { %4686 = vsyncadd [#allocation5], 4294967264 }
  0x63   :  { %4687 = dma.done.wait [#allocation8], 1024  }
  0x64   :  { %4688 = vsyncadd [#allocation8], 4294966272  ;;  %vm159_vm0 = vcmask 1043456   ;;  %vm134_vm1 = vcmask 31744   ;;  %v126_v0 = vld [vmem:[#allocation2] sm:$0xf] }
  0x65   :  { %s5480_s18 = sld [smem:[#allocation13_spill]]  ;;  %3776 = vmatprep.subr.msk.mxu0 %vm159_vm0, %v126_v0  ;;  %v3506_v9 = vld [vmem:[%s5458_s2] ss:$0 sm:$0xff]  ;;  %vm310_vm2 = vcmask 261120   ;;  %vm4697_vm3 = vmmov 0   ;;  %s4699_s24 = smov 64  }
  0x66   :  { %3777 = vmatpush3.msk.msra.mxu0 %vm159_vm0, %v126_v0  ;;  %s4701_s19 = smov 96  }
  0x6b   :  { %v118_v1 = vld [vmem:[%s5480_s18] sm:$0xff]  ;;  %v119_v2 = vld [vmem:[%s5480_s18 + $0x8] sm:$0xff]  ;;  %v120_v3 = vld [vmem:[%s5480_s18 + $0x10] sm:$0xff] }
  0x6c   :  { %3778 = vmatprep.mubr.msk.f32.mxu0 %vm134_vm1, %v118_v1  ;;  %v121_v4 = vld [vmem:[%s5480_s18 + $0x18] sm:$0xff]  ;;  %v122_v5 = vld [vmem:[%s5480_s18 + $0x20] sm:$0xff]  ;;  %v123_v6 = vld [vmem:[%s5480_s18 + $0x28] sm:$0xff] }
  0x6d   :  { %3779 = vmatmul.mubr.msk.f32.vlgmr.msra.gmra.mrb[0].mxu0 %vm134_vm1, %v119_v2  ;;  %v124_v7 = vld [vmem:[%s5480_s18 + $0x30] sm:$0xff]  ;;  %v125_v8 = vld [vmem:[%s5480_s18 + $0x38] sm:$0xff] }
  0x6e   :  { %3781 = vmatprep.mubr.msk.f32.mxu0 %vm134_vm1, %v120_v3 }
  0x71   :  { %3782 = vmatmul.mubr.msk.f32.gmra.mrb[2].mxu0 %vm134_vm1, %v121_v4 }
  0x72   :  { %3784 = vmatprep.mubr.msk.f32.mxu0 %vm134_vm1, %v122_v5 }
  0x75   :  { %3785 = vmatmul.mubr.msk.f32.gmra.mrb[4].mxu0 %vm134_vm1, %v123_v6 }
  0x76   :  { %3787 = vmatprep.mubr.msk.f32.mxu0 %vm134_vm1, %v124_v7 }
  0x79   :  { %3788 = vmatmul.mubr.msk.f32.gmra.mrb[6].mxu0 %vm134_vm1, %v125_v8 }
 0x140   :  { %v3780_v10 = vpop.f32.mrb[0].mxu0 }
 0x141   :  { %v235_v11 = vadd.f32 %v3780_v10, %v3506_v9  ;;  %v229_v12 = vpop.f32.mrb[1].mxu0  ;;  %v584_v10 = vld [vmem:[%s5463_s7] sm:$0xff] }
 0x142   :  { %v230_v13 = vadd.f32 %v3506_v9, %v229_v12  ;;  %v586_v12 = vld [vmem:[%s5463_s7 + $0x10] sm:$0xff] }
 0x143   :  { %v277_v14 = vmul.f32 0.70710677, %v235_v11  ;;  %v269_v40 = vmul.f32 0.5, %v235_v11  ;;  %v585_v11 = vld [vmem:[%s5463_s7 + $0x8] sm:$0xff] }
 0x144   :  { %v276_v15 = vmul.f32 0.70710677, %v230_v13  ;;  %v3783_v16 = vpop.f32.mrb[2].mxu0  ;;  %v268_v36 = vmul.f32 0.5, %v230_v13  ;;  %v4696_v13 = vmov 0.0|0.0  }
 0x145   :  { %4409 = verf.f32 %v277_v14  ;;  %v245_v17 = vadd.f32 %v3783_v16, %v3506_v9  ;;  %v239_v18 = vpop.f32.mrb[3].mxu0  ;;  %4192 = vmatprep.subr.bf16.mxu0 %v4696_v13  ;;  %v4942_v14 = vpack.c.bf16 %v585_v11, %v584_v10  ;;  %v4698_v16 = vmov 0.0  }
 0x146   :  { %4411 = verf.f32 %v276_v15  ;;  %v240_v19 = vadd.f32 %v3506_v9, %v239_v18  ;;  %v587_v15 = vld [vmem:[%s5463_s7 + $0x18] sm:$0xff]  ;;  %3818 = vmatprep.mubr.msk.f32.mxu0 %vm4697_vm3, %v4698_v16  ;;  %v592_v18 = vld [vmem:[%s5465_s9] sm:$0xff] }
 0x147   :  { %v279_v20 = vmul.f32 0.70710677, %v245_v17  ;;  %v271_v41 = vmul.f32 0.5, %v245_v17  ;;  %4194 = vmatpush3.bf16.msra.mxu0 %v4942_v14  ;;  %v4950_v17 = vpack.c.bf16 %v587_v15, %v586_v12 }
 0x148   :  { %v278_v21 = vmul.f32 0.70710677, %v240_v19  ;;  %v3786_v22 = vpop.f32.mrb[4].mxu0  ;;  %v270_v42 = vmul.f32 0.5, %v240_v19  ;;  %4195 = vmatprep.subr.bf16.mxu0 %v4696_v13  ;;  %v593_v19 = vld [vmem:[%s5465_s9 + $0x8] sm:$0xff] }
 0x149   :  { %4413 = verf.f32 %v279_v20  ;;  %v255_v23 = vadd.f32 %v3786_v22, %v3506_v9  ;;  %v249_v24 = vpop.f32.mrb[5].mxu0  ;;  %v4960_v20 = vpack.c.bf16 %v593_v19, %v592_v18  ;;  %v595_v22 = vld [vmem:[%s5465_s9 + $0x18] sm:$0xff] }
 0x14a   :  { %4415 = verf.f32 %v278_v21  ;;  %v250_v25 = vadd.f32 %v3506_v9, %v249_v24  ;;  %v594_v21 = vld [vmem:[%s5465_s9 + $0x10] sm:$0xff] }
 0x14b   :  { %v281_v26 = vmul.f32 0.70710677, %v255_v23  ;;  %v273_v50 = vmul.f32 0.5, %v255_v23  ;;  %4197 = vmatpush3.bf16.msra.mxu0 %v4950_v17  ;;  %v4971_v23 = vpack.c.bf16 %v595_v22, %v594_v21 }
 0x14c   :  { %v280_v27 = vmul.f32 0.70710677, %v250_v25  ;;  %v3789_v28 = vpop.f32.mrb[6].mxu0  ;;  %v272_v51 = vmul.f32 0.5, %v250_v25  ;;  %4204 = vmatprep.subr.bf16.mxu0 %v4696_v13 }
 0x14d   :  { %4417 = verf.f32 %v281_v26  ;;  %v265_v29 = vadd.f32 %v3789_v28, %v3506_v9  ;;  %v259_v30 = vpop.f32.mrb[7].mxu0 }
 0x14e   :  { %4419 = verf.f32 %v280_v27  ;;  %v260_v31 = vadd.f32 %v3506_v9, %v259_v30  ;;  %3819 = vmatmul.mubr.f32.vlgmr.msra.gmra.mrb[8].mxu0 %v4698_v16 }
 0x14f   :  { %v4410_v32 = vpop.eup %4409  ;;  %v283_v33 = vmul.f32 0.70710677, %v265_v29  ;;  %v275_v59 = vmul.f32 0.5, %v265_v29  ;;  %4206 = vmatpush3.bf16.msra.mxu0 %v4960_v20  ;;  %3840 = vmatprep.mubr.msk.f32.mxu0 %vm4697_vm3, %v4698_v16 }
 0x150   :  { %v4412_v34 = vpop.eup %4411  ;;  %v282_v35 = vmul.f32 0.70710677, %v260_v31  ;;  %v293_v38 = vadd.f32 1.0, %v4410_v32  ;;  %v274_v61 = vmul.f32 0.5, %v260_v31  ;;  %4207 = vmatprep.subr.bf16.mxu0 %v4696_v13 }
 0x151   :  { %4421 = verf.f32 %v283_v33  ;;  %v292_v37 = vadd.f32 1.0, %v4412_v34 }
 0x152   :  { %4423 = verf.f32 %v282_v35  ;;  %v4904_v48 = vmul.f32 %v293_v38, %v269_v40 }
 0x153   :  { %v4414_v39 = vpop.eup %4413  ;;  %v4900_v43 = vmul.f32 %v292_v37, %v268_v36  ;;  %4209 = vmatpush3.bf16.msra.mxu0 %v4971_v23 }
 0x154   :  { %v4416_v44 = vpop.eup %4415  ;;  %v295_v45 = vadd.f32 1.0, %v4414_v39  ;;  %v314_v57 = vsel %vm310_vm2, %v4904_v48, 0.0  ;;  %4216 = vmatprep.subr.bf16.mxu0 %v4696_v13 }
 0x155   :  { %v311_v46 = vsel %vm310_vm2, %v4900_v43, 0.0  ;;  %v294_v47 = vadd.f32 1.0, %v4416_v44 }
 0x156   :  { %312 = vadd.xlane.f32.xlu0 %v311_v46  ;;  %v4908_v53 = vmul.f32 %v295_v45, %v271_v41  ;;  %3841 = vmatmul.mubr.f32.vlgmr.msra.gmra.mrb[10].mxu0 %v4698_v16 }
 0x157   :  { %v4418_v49 = vpop.eup %4417  ;;  %v4906_v52 = vmul.f32 %v294_v47, %v270_v42  ;;  %4218 = vmatpush3.bf16.msra.mxu0 %v4942_v14  ;;  %3862 = vmatprep.mubr.msk.f32.mxu0 %vm4697_vm3, %v4698_v16 }
 0x158   :  { %v4420_v54 = vpop.eup %4419  ;;  %v297_v55 = vadd.f32 1.0, %v4418_v49  ;;  %v320_v62 = vsel %vm310_vm2, %v4908_v53, 0.0  ;;  %4219 = vmatprep.subr.bf16.mxu0 %v4696_v13 }
 0x159   :  { %v317_v56 = vsel %vm310_vm2, %v4906_v52, 0.0  ;;  %v296_v58 = vadd.f32 1.0, %v4420_v54 }
 0x15a   :  { %318 = vadd.xlane.f32.xlu1 %v317_v56  ;;  %315 = vadd.xlane.f32.xlu0 %v314_v57  ;;  %v4918_v0 = vmul.f32 %v297_v55, %v273_v50 }
 0x15b   :  { %v4422_v60 = vpop.eup %4421  ;;  %v4916_v63 = vmul.f32 %v296_v58, %v272_v51  ;;  %4221 = vmatpush3.bf16.msra.mxu0 %v4950_v17 }
 0x15c   :  { %v4424_v1 = vpop.eup %4423  ;;  %v299_v2 = vadd.f32 1.0, %v4422_v60  ;;  %v326_v5 = vsel %vm310_vm2, %v4918_v0, 0.0  ;;  %4228 = vmatprep.subr.bf16.mxu0 %v4696_v13 }
 0x15d   :  { %v323_v3 = vsel %vm310_vm2, %v4916_v63, 0.0  ;;  %v298_v4 = vadd.f32 1.0, %v4424_v1  ;;  %v445_v1 = vld [vmem:[%s5461_s5 + $0x8] sm:$0xff] }
 0x15e   :  { %321 = vadd.xlane.f32.xlu1 %v320_v62  ;;  %324 = vadd.xlane.f32.xlu0 %v323_v3  ;;  %v4926_v7 = vmul.f32 %v299_v2, %v275_v59  ;;  %v446_v3 = vld [vmem:[%s5461_s5 + $0x10] sm:$0xff] }
 0x15f   :  { %v4924_v6 = vmul.f32 %v298_v4, %v274_v61  ;;  %v447_v4 = vld [vmem:[%s5461_s5 + $0x18] sm:$0xff] }
 0x160   :  { %v332_v9 = vsel %vm310_vm2, %v4926_v7, 0.0 }
 0x161   :  { %v329_v8 = vsel %vm310_vm2, %v4924_v6, 0.0 }
 0x162   :  { %327 = vadd.xlane.f32.xlu1 %v326_v5  ;;  %330 = vadd.xlane.f32.xlu0 %v329_v8  ;;  %v4188_v5 = vpack.c.bf16 %v447_v4, %v446_v3 }
 0x166   :  { %333 = vadd.xlane.f32.xlu1 %v332_v9 }
 0x1e3   :  { %v313_v24 = vpop.xlane.xlu0 %312 }
 0x1e4   :  { %v336_v25 = vmul.f32 0.03125, %v313_v24 }
 0x1e6   :  { %v4986_v26 = vsub.f32 %v4900_v43, %v336_v25 }
 0x1e7   :  { %v319_v27 = vpop.xlane.xlu1 %318  ;;  %v316_v28 = vpop.xlane.xlu0 %315 }
 0x1e8   :  { %v338_v29 = vmul.f32 0.03125, %v319_v27  ;;  %v337_v30 = vmul.f32 0.03125, %v316_v28  ;;  %v352_v31 = vmul.f32 %v4986_v26, %v4986_v26 }
 0x1ea   :  { %v4991_v32 = vsub.f32 %v4906_v52, %v338_v29  ;;  %v4994_v33 = vsub.f32 %v4904_v48, %v337_v30  ;;  %v360_v34 = vsel %vm310_vm2, %v352_v31, 0.0 }
 0x1eb   :  { %v322_v35 = vpop.xlane.xlu1 %321  ;;  %361 = vadd.xlane.f32.xlu0 %v360_v34  ;;  %v325_v36 = vpop.xlane.xlu0 %324 }
 0x1ec   :  { %v339_v37 = vmul.f32 0.03125, %v322_v35  ;;  %v340_v38 = vmul.f32 0.03125, %v325_v36  ;;  %v354_v39 = vmul.f32 %v4991_v32, %v4991_v32  ;;  %v353_v40 = vmul.f32 %v4994_v33, %v4994_v33 }
 0x1ee   :  { %v5002_v41 = vsub.f32 %v4908_v53, %v339_v37  ;;  %v5005_v42 = vsub.f32 %v4916_v63, %v340_v38  ;;  %v366_v43 = vsel %vm310_vm2, %v354_v39, 0.0  ;;  %v363_v44 = vsel %vm310_vm2, %v353_v40, 0.0 }
 0x1ef   :  { %v328_v45 = vpop.xlane.xlu1 %327  ;;  %367 = vadd.xlane.f32.xlu0 %v366_v43  ;;  %364 = vadd.xlane.f32.xlu1 %v363_v44  ;;  %v331_v46 = vpop.xlane.xlu0 %330  ;;  %v3516_v43 = vld [vmem:[%s5459_s3] ss:$0 sm:$0xff] }
 0x1f0   :  { %v341_v47 = vmul.f32 0.03125, %v328_v45  ;;  %v342_v48 = vmul.f32 0.03125, %v331_v46  ;;  %v355_v49 = vmul.f32 %v5002_v41, %v5002_v41  ;;  %v356_v50 = vmul.f32 %v5005_v42, %v5005_v42 }
 0x1f2   :  { %v5014_v51 = vsub.f32 %v4918_v0, %v341_v47  ;;  %v5017_v52 = vsub.f32 %v4924_v6, %v342_v48  ;;  %v369_v53 = vsel %vm310_vm2, %v355_v49, 0.0  ;;  %v372_v54 = vsel %vm310_vm2, %v356_v50, 0.0  ;;  %v444_v0 = vld [vmem:[%s5461_s5] sm:$0xff]  ;;  %s5481_s5 = sld [smem:[#allocation15_spill]] }
 0x1f3   :  { %v334_v55 = vpop.xlane.xlu1 %333  ;;  %370 = vadd.xlane.f32.xlu1 %v369_v53  ;;  %373 = vadd.xlane.f32.xlu0 %v372_v54  ;;  %v4184_v2 = vpack.c.bf16 %v445_v1, %v444_v0  ;;  %v3517_v47 = vld [vmem:[#allocation4] ss:$0 sm:$0xff]  ;;  %v590_v1 = vld [vmem:[%s5464_s8 + $0x10] sm:$0xff] }
 0x1f4   :  { %v343_v56 = vmul.f32 0.03125, %v334_v55  ;;  %v357_v57 = vmul.f32 %v5014_v51, %v5014_v51  ;;  %v358_v58 = vmul.f32 %v5017_v52, %v5017_v52 }
 0x1f5   :  { %4185 = vmatprep.subr.bf16.mxu1 %v4184_v2 }
 0x1f6   :  { %v5026_v59 = vsub.f32 %v4926_v7, %v343_v56  ;;  %v375_v60 = vsel %vm310_vm2, %v357_v57, 0.0  ;;  %v378_v61 = vsel %vm310_vm2, %v358_v58, 0.0  ;;  %4187 = vmatpush3.bf16.msra.mxu1 %v4184_v2  ;;  %v588_v56 = vld [vmem:[%s5464_s8] sm:$0xff]  ;;  %v589_v57 = vld [vmem:[%s5464_s8 + $0x8] sm:$0xff]  ;;  %v591_v2 = vld [vmem:[%s5464_s8 + $0x18] sm:$0xff]  ;;  %s4700_s8 = smov 32  }
 0x1f7   :  { %376 = vadd.xlane.f32.xlu1 %v375_v60  ;;  %379 = vadd.xlane.f32.xlu0 %v378_v61 }
 0x1f8   :  { %v359_v62 = vmul.f32 %v5026_v59, %v5026_v59  ;;  %4189 = vmatprep.subr.bf16.mxu1 %v4188_v5 }
 0x1fa   :  { %v381_v63 = vsel %vm310_vm2, %v359_v62, 0.0  ;;  %4191 = vmatpush3.bf16.msra.mxu1 %v4188_v5  ;;  %v5062_v62 = vpack.c.bf16 %v589_v57, %v588_v56 }
 0x1fb   :  { %382 = vadd.xlane.f32.xlu1 %v381_v63  ;;  %4198 = vmatprep.subr.bf16.mxu1 %v4696_v13 }
 0x221   :  { %v5046_v6 = vpop.f32.mrb[8].mxu0 }
 0x222   :  { %v3820_v7 = vpop.f32.mrb[9].mxu0 }
 0x229   :  { %v827_v8 = vpop.f32.mrb[10].mxu0 }
 0x22a   :  { %v3842_v9 = vpop.f32.mrb[11].mxu0  ;;  %832 = vrot.lane.b32.xlu0 %v827_v8, %s4699_s24 }
 0x278   :  { %v362_v10 = vpop.xlane.xlu0 %361 }
 0x279   :  { %v384_v11 = vmul.f32 0.03125, %v362_v10 }
 0x27b   :  { %v392_v12 = vadd.f32 1e-05, %v384_v11 }
 0x27c   :  { %v365_v15 = vpop.xlane.xlu1 %364  ;;  %v368_v18 = vpop.xlane.xlu0 %367 }
 0x27d   :  { %4425 = vrsqrt.f32 %v392_v12  ;;  %v385_v19 = vmul.f32 0.03125, %v365_v15  ;;  %v386_v21 = vmul.f32 0.03125, %v368_v18 }
 0x27f   :  { %v393_v22 = vadd.f32 1e-05, %v385_v19  ;;  %v394_v24 = vadd.f32 1e-05, %v386_v21 }
 0x280   :  { %v371_v25 = vpop.xlane.xlu1 %370  ;;  %v374_v27 = vpop.xlane.xlu0 %373 }
 0x281   :  { %4427 = vrsqrt.f32 %v393_v22  ;;  %v387_v28 = vmul.f32 0.03125, %v371_v25  ;;  %v388_v29 = vmul.f32 0.03125, %v374_v27  ;;  %v597_v25 = vld [vmem:[#allocation7 + $0x8] sm:$0xff] }
 0x282   :  { %4429 = vrsqrt.f32 %v394_v24  ;;  %v596_v24 = vld [vmem:[#allocation7] sm:$0xff] }
 0x283   :  { %v395_v30 = vadd.f32 1e-05, %v387_v28  ;;  %v396_v31 = vadd.f32 1e-05, %v388_v29  ;;  %v5090_v27 = vpack.c.bf16 %v597_v25, %v596_v24  ;;  %v598_v28 = vld [vmem:[#allocation7 + $0x10] sm:$0xff] }
 0x284   :  { %v377_v34 = vpop.xlane.xlu1 %376  ;;  %v380_v35 = vpop.xlane.xlu0 %379 }
 0x285   :  { %4431 = vrsqrt.f32 %v395_v30  ;;  %v389_v36 = vmul.f32 0.03125, %v377_v34  ;;  %v390_v37 = vmul.f32 0.03125, %v380_v35  ;;  %v3518_v30 = vld [vmem:[#allocation6] ss:$0 sm:$0xff] }
 0x286   :  { %4433 = vrsqrt.f32 %v396_v31 }
 0x287   :  { %v4426_v38 = vpop.eup %4425  ;;  %v397_v39 = vadd.f32 1e-05, %v389_v36  ;;  %v398_v40 = vadd.f32 1e-05, %v390_v37 }
 0x288   :  { %v383_v44 = vpop.xlane.xlu1 %382  ;;  %v408_v45 = vmul.f32 %v4426_v38, %v4986_v26 }
 0x289   :  { %4435 = vrsqrt.f32 %v397_v39  ;;  %v391_v46 = vmul.f32 0.03125, %v383_v44 }
 0x28a   :  { %4437 = vrsqrt.f32 %v398_v40  ;;  %v422_v48 = vmul.f32 %v3516_v43, %v408_v45 }
 0x28b   :  { %v4428_v49 = vpop.eup %4427  ;;  %v399_v50 = vadd.f32 1e-05, %v391_v46 }
 0x28c   :  { %v4430_v53 = vpop.eup %4429  ;;  %v436_v54 = vadd.f32 %v3517_v47, %v422_v48  ;;  %v409_v55 = vmul.f32 %v4428_v49, %v4994_v33 }
 0x28d   :  { %4439 = vrsqrt.f32 %v399_v50  ;;  %v410_v26 = vmul.f32 %v4430_v53, %v4991_v32 }
 0x28e   :  { %3798 = vmatprep.mubr.msk.f32.mxu1 %vm310_vm2, %v436_v54  ;;  %v423_v58 = vmul.f32 %v3516_v43, %v409_v55 }
 0x28f   :  { %v4432_v60 = vpop.eup %4431  ;;  %v424_v61 = vmul.f32 %v3516_v43, %v410_v26 }
 0x290   :  { %v4434_v63 = vpop.eup %4433  ;;  %v437_v33 = vadd.f32 %v3517_v47, %v423_v58  ;;  %v411_v0 = vmul.f32 %v4432_v60, %v5002_v41  ;;  %v5075_v41 = vpack.c.bf16 %v591_v2, %v590_v1 }
 0x291   :  { %v438_v32 = vadd.f32 %v3517_v47, %v424_v61  ;;  %v412_v3 = vmul.f32 %v4434_v63, %v5005_v42 }
 0x292   :  { %3799 = vmatmul.mubr.msk.f32.vlgmr.msra.gmra.mrb[0].mxu1 %vm310_vm2, %v437_v33  ;;  %v425_v4 = vmul.f32 %v3516_v43, %v411_v0 }
 0x293   :  { %v4436_v5 = vpop.eup %4435  ;;  %3801 = vmatprep.mubr.msk.f32.mxu1 %vm310_vm2, %v438_v32  ;;  %v426_v7 = vmul.f32 %v3516_v43, %v412_v3  ;;  %4200 = vmatpush3.bf16.msra.mxu1 %v5062_v62 }
 0x294   :  { %v4438_v8 = vpop.eup %4437  ;;  %v439_v9 = vadd.f32 %v3517_v47, %v425_v4  ;;  %v413_v10 = vmul.f32 %v4436_v5, %v5014_v51  ;;  %4201 = vmatprep.subr.bf16.mxu1 %v4696_v13 }
 0x295   :  { %v440_v11 = vadd.f32 %v3517_v47, %v426_v7  ;;  %v414_v42 = vmul.f32 %v4438_v8, %v5017_v52 }
 0x296   :  { %3802 = vmatmul.mubr.msk.f32.gmra.mrb[2].mxu1 %vm310_vm2, %v439_v9  ;;  %v427_v12 = vmul.f32 %v3516_v43, %v413_v10 }
 0x297   :  { %v4440_v15 = vpop.eup %4439  ;;  %3804 = vmatprep.mubr.msk.f32.mxu1 %vm310_vm2, %v440_v11  ;;  %v428_v18 = vmul.f32 %v3516_v43, %v414_v42  ;;  %4203 = vmatpush3.bf16.msra.mxu1 %v5075_v41 }
 0x298   :  { %v441_v19 = vadd.f32 %v3517_v47, %v427_v12  ;;  %v415_v21 = vmul.f32 %v4440_v15, %v5026_v59  ;;  %4210 = vmatprep.subr.bf16.mxu1 %v4696_v13  ;;  %v599_v59 = vld [vmem:[#allocation7 + $0x18] sm:$0xff] }
 0x299   :  { %v442_v51 = vadd.f32 %v3517_v47, %v428_v18  ;;  %v5094_v29 = vpack.c.bf16 %v599_v59, %v598_v28 }
 0x29a   :  { %3805 = vmatmul.mubr.msk.f32.gmra.mrb[4].mxu1 %vm310_vm2, %v441_v19  ;;  %v429_v22 = vmul.f32 %v3516_v43, %v415_v21 }
 0x29b   :  { %3807 = vmatprep.mubr.msk.f32.mxu1 %vm310_vm2, %v442_v51 }
 0x29c   :  { %v443_v52 = vadd.f32 %v3517_v47, %v429_v22  ;;  %v833_v36 = vpop.permute.xlu0 %832 }
 0x29e   :  { %3808 = vmatmul.mubr.msk.f32.gmra.mrb[6].mxu1 %vm310_vm2, %v443_v52 }
 0x29f   :  { %3829 = vmatprep.mubr.msk.f32.mxu1 %vm4697_vm3, %v4698_v16 }
 0x2a2   :  { %3830 = vmatmul.mubr.f32.vlgmr.msra.gmra.mrb[8].mxu1 %v4698_v16 }
 0x2a3   :  { %4212 = vmatpush3.bf16.msra.mxu1 %v5090_v27  ;;  %3851 = vmatprep.mubr.msk.f32.mxu1 %vm4697_vm3, %v4698_v16 }
 0x2a4   :  { %4213 = vmatprep.subr.bf16.mxu1 %v4696_v13 }
 0x2a7   :  { %4215 = vmatpush3.bf16.msra.mxu1 %v5094_v29 }
 0x2a8   :  { %4222 = vmatprep.subr.bf16.mxu1 %v4696_v13 }
 0x2aa   :  { %3852 = vmatmul.mubr.f32.vlgmr.msra.gmra.mrb[10].mxu1 %v4698_v16 }
 0x2ab   :  { %4224 = vmatpush3.bf16.msra.mxu1 %v5062_v62  ;;  %3873 = vmatprep.mubr.msk.f32.mxu1 %vm4697_vm3, %v4698_v16 }
 0x2ac   :  { %4225 = vmatprep.subr.bf16.mxu1 %v4696_v13 }
 0x2af   :  { %4227 = vmatpush3.bf16.msra.mxu1 %v5075_v41 }
 0x2b0   :  { %4234 = vmatprep.subr.bf16.mxu1 %v4696_v13 }
 0x365   :  { %v3800_v31 = vpop.f32.mrb[0].mxu1 }
 0x366   :  { %v5108_v34 = vadd.f32 %v3800_v31, %v3518_v30  ;;  %v545_v35 = vpop.f32.mrb[1].mxu1 }
 0x367   :  { %v546_v37 = vadd.f32 %v3518_v30, %v545_v35 }
 0x369   :  { %v835_v38 = vadd.f32 %v833_v36, %v546_v37  ;;  %v3803_v39 = vpop.f32.mrb[2].mxu1  ;;  %v673_v60 = vadd.f32 %v5046_v6, %v546_v37 }
 0x36a   :  { %v5110_v40 = vadd.f32 %v3803_v39, %v3518_v30  ;;  %v555_v43 = vpop.f32.mrb[3].mxu1 }
 0x36b   :  { %4441 = vtanh.f32 %v835_v38  ;;  %v5112_v44 = vadd.f32 %v3518_v30, %v555_v43  ;;  %v3527_v61 = vmul.f32 -1.442695, %v673_v60 }
 0x36d   :  { %v3806_v45 = vpop.f32.mrb[4].mxu1  ;;  %4443 = vpow2.f32 %v3527_v61 }
 0x36e   :  { %v5114_v46 = vadd.f32 %v3806_v45, %v3518_v30  ;;  %v565_v47 = vpop.f32.mrb[5].mxu1 }
 0x36f   :  { %v5116_v48 = vadd.f32 %v3518_v30, %v565_v47 }
 0x371   :  { %v3809_v49 = vpop.f32.mrb[6].mxu1 }
 0x372   :  { %v5118_v50 = vadd.f32 %v3809_v49, %v3518_v30  ;;  %v575_v53 = vpop.f32.mrb[7].mxu1 }
 0x373   :  { %v5120_v54 = vadd.f32 %v3518_v30, %v575_v53 }
 0x375   :  { %v4442_v55 = vpop.eup %4441  ;;  %v746_v56 = vpop.f32.mrb[8].mxu1 }
 0x376   :  { %920 = vrot.lane.b32.xlu1 %v4442_v55, %s4699_s24  ;;  %v3831_v57 = vpop.f32.mrb[9].mxu1 }
 0x377   :  { %v4444_v63 = vpop.eup %4443 }
 0x378   :  { %v677_v33 = vadd.f32 1.0, %v4444_v63 }
 0x37a   :  { %751 = vrot.lane.b32.xlu1 %v746_v56, %s4700_s8  ;;  %4445 = vrcp.f32 %v677_v33 }
 0x37d   :  { %v903_v26 = vpop.f32.mrb[10].mxu1 }
 0x37e   :  { %908 = vrot.lane.b32.xlu0 %v903_v26, %s4701_s19  ;;  %v3853_v58 = vpop.f32.mrb[11].mxu1 }
 0x384   :  { %v4446_v0 = vpop.eup %4445 }
 0x3e8   :  { %v921_v1 = vpop.permute.xlu1 %920 }
 0x3e9   :  { %v923_v2 = vmul.f32 %v4446_v0, %v921_v1 }
 0x3eb   :  { %925 = vrot.lane.b32.xlu1 %v923_v2, %s4700_s8 }
 0x3ec   :  { %v752_v32 = vpop.permute.xlu1 %751 }
 0x3ed   :  { %v754_v3 = vadd.f32 %v752_v32, %v546_v37 }
 0x3ef   :  { %v3528_v4 = vmul.f32 -1.442695, %v754_v3 }
 0x3f0   :  { %v909_v42 = vpop.permute.xlu0 %908 }
 0x3f1   :  { %4447 = vpow2.f32 %v3528_v4  ;;  %v911_v12 = vadd.f32 %v909_v42, %v546_v37 }
 0x3f3   :  { %v3529_v15 = vmul.f32 -1.442695, %v911_v12 }
 0x3fb   :  { %v4448_v5 = vpop.eup %4447 }
 0x3fc   :  { %v758_v7 = vadd.f32 1.0, %v4448_v5 }
 0x3fe   :  { %4449 = vrcp.f32 %v758_v7 }
 0x408   :  { %v4450_v8 = vpop.eup %4449 }
 0x409   :  { %v918_v9 = vmul.f32 0.0, %v4450_v8 }
 0x45d   :  { %v926_v6 = vpop.permute.xlu1 %925 }
 0x45e   :  { %v5127_v10 = vadd.f32 %v926_v6, %v918_v9 }
 0x460   :  { %4451 = vtanh.f32 %v5127_v10 }
 0x461   :  { %4453 = vpow2.f32 %v3529_v15 }
 0x46a   :  { %v4452_v11 = vpop.eup %4451 }
 0x46b   :  { %931 = vrot.lane.b32.xlu1 %v4452_v11, %s4699_s24  ;;  %v4454_v18 = vpop.eup %4453 }
 0x46c   :  { %v915_v19 = vadd.f32 1.0, %v4454_v18 }
 0x46e   :  { %4455 = vrcp.f32 %v915_v19 }
 0x478   :  { %v4456_v21 = vpop.eup %4455 }
 0x4dd   :  { %v932_v51 = vpop.permute.xlu1 %931 }
 0x4de   :  { %v934_v22 = vmul.f32 %v4456_v21, %v932_v51 }
 0x4e0   :  { %936 = vrot.lane.b32.xlu0 %v934_v22, %s4700_s8 }
 0x552   :  { %v937_v52 = vpop.permute.xlu0 %936 }
 0x553   :  { %3863 = vmatmul.mubr.msk.f32.vlgmr.msra.gmra.mrb[12].mxu0 %vm310_vm2, %v937_v52  ;;  %3874 = vmatmul.mubr.msk.f32.vlgmr.msra.gmra.mrb[12].mxu1 %vm310_vm2, %v937_v52 }
 0x554   :  { %4230 = vmatpush3.bf16.msra.mxu0 %v4960_v20  ;;  %4236 = vmatpush3.bf16.msra.mxu1 %v5090_v27 }
 0x555   :  { %4231 = vmatprep.subr.bf16.mxu0 %v4696_v13  ;;  %4237 = vmatprep.subr.bf16.mxu1 %v4696_v13 }
 0x556   :  { %3884 = vmatprep.mubr.msk.f32.mxu0 %vm4697_vm3, %v4698_v16  ;;  %3895 = vmatprep.mubr.msk.f32.mxu1 %vm4697_vm3, %v4698_v16 }
 0x558   :  { %4233 = vmatpush3.bf16.msra.mxu0 %v4971_v23  ;;  %4239 = vmatpush3.bf16.msra.mxu1 %v5094_v29 }
 0x559   :  { %4240 = vmatprep.subr.bf16.mxu0 %v4696_v13  ;;  %4246 = vmatprep.subr.bf16.mxu1 %v4696_v13 }
 0x55b   :  { %3885 = vmatmul.mubr.msk.f32.vlgmr.msra.gmra.mrb[14].mxu0 %vm310_vm2, %v937_v52  ;;  %3896 = vmatmul.mubr.msk.f32.vlgmr.msra.gmra.mrb[14].mxu1 %vm310_vm2, %v937_v52 }
 0x55c   :  { %4242 = vmatpush3.bf16.msra.mxu0 %v4942_v14  ;;  %4248 = vmatpush3.bf16.msra.mxu1 %v5062_v62 }
 0x55d   :  { %4243 = vmatprep.subr.bf16.mxu0 %v4696_v13  ;;  %4249 = vmatprep.subr.bf16.mxu1 %v4696_v13 }
 0x55e   :  { %3906 = vmatprep.mubr.msk.f32.mxu0 %vm4697_vm3, %v4698_v16  ;;  %3917 = vmatprep.mubr.msk.f32.mxu1 %vm4697_vm3, %v4698_v16 }
 0x560   :  { %4245 = vmatpush3.bf16.msra.mxu0 %v4950_v17  ;;  %4251 = vmatpush3.bf16.msra.mxu1 %v5075_v41 }
 0x561   :  { %4252 = vmatprep.subr.bf16.mxu0 %v4696_v13  ;;  %4258 = vmatprep.subr.bf16.mxu1 %v4696_v13 }
 0x626   :  { %v1006_v24 = vpop.f32.mrb[12].mxu0  ;;  %v1083_v25 = vpop.f32.mrb[12].mxu1 }
 0x627   :  { %v3864_v28 = vpop.f32.mrb[13].mxu0  ;;  %v3875_v59 = vpop.f32.mrb[13].mxu1  ;;  %v1010_v43 = vadd.f32 %v1006_v24, %v5108_v34 }
 0x629   :  { %v3531_v45 = vmul.f32 -1.442695, %v1010_v43 }
 0x62e   :  { %v1164_v30 = vpop.f32.mrb[14].mxu0  ;;  %v1240_v31 = vpop.f32.mrb[14].mxu1 }
 0x62f   :  { %v3897_v35 = vpop.f32.mrb[15].mxu1  ;;  %1169 = vrot.lane.b32.xlu1 %v1164_v30, %s4699_s24  ;;  %v3886_v36 = vpop.f32.mrb[15].mxu0 }
 0x633   :  { %1088 = vrot.lane.b32.xlu1 %v1083_v25, %s4700_s8 }
 0x637   :  { %1245 = vrot.lane.b32.xlu1 %v1240_v31, %s4701_s19 }
 0x6a1   :  { %v1170_v37 = vpop.permute.xlu1 %1169 }
 0x6a2   :  { %v1172_v38 = vadd.f32 %v1170_v37, %v5108_v34 }
 0x6a4   :  { %4457 = vtanh.f32 %v1172_v38 }
 0x6a5   :  { %4459 = vpow2.f32 %v3531_v45  ;;  %v1089_v57 = vpop.permute.xlu1 %1088 }
 0x6a6   :  { %v1091_v26 = vadd.f32 %v1089_v57, %v5108_v34 }
 0x6a8   :  { %v3533_v58 = vmul.f32 -1.442695, %v1091_v26 }
 0x6a9   :  { %v1246_v32 = vpop.permute.xlu1 %1245 }
 0x6aa   :  { %v1248_v3 = vadd.f32 %v1246_v32, %v5108_v34 }
 0x6ac   :  { %v3536_v4 = vmul.f32 -1.442695, %v1248_v3 }
 0x6ae   :  { %v4458_v39 = vpop.eup %4457 }
 0x6af   :  { %1257 = vrot.lane.b32.xlu0 %v4458_v39, %s4699_s24  ;;  %v4460_v47 = vpop.eup %4459 }
 0x6b0   :  { %v1014_v49 = vadd.f32 1.0, %v4460_v47 }
 0x6b2   :  { %4461 = vrcp.f32 %v1014_v49 }
 0x6b3   :  { %4463 = vpow2.f32 %v3533_v58 }
 0x6bc   :  { %v4462_v53 = vpop.eup %4461 }
 0x6bd   :  { %v4464_v60 = vpop.eup %4463 }
 0x6be   :  { %v1095_v61 = vadd.f32 1.0, %v4464_v60 }
 0x6c0   :  { %4465 = vrcp.f32 %v1095_v61 }
 0x6ca   :  { %v4466_v63 = vpop.eup %4465 }
 0x6cb   :  { %v1255_v33 = vmul.f32 %v4466_v63, %v5127_v10 }
 0x721   :  { %v1258_v55 = vpop.permute.xlu0 %1257 }
 0x722   :  { %v1260_v56 = vmul.f32 %v4462_v53, %v1258_v55 }
 0x724   :  { %1262 = vrot.lane.b32.xlu0 %v1260_v56, %s4700_s8 }
 0x796   :  { %v1263_v0 = vpop.permute.xlu0 %1262 }
 0x797   :  { %v5169_v1 = vadd.f32 %v1263_v0, %v1255_v33 }
 0x799   :  { %4467 = vtanh.f32 %v5169_v1 }
 0x79a   :  { %4469 = vpow2.f32 %v3536_v4 }
 0x7a3   :  { %v4468_v2 = vpop.eup %4467 }
 0x7a4   :  { %1268 = vrot.lane.b32.xlu0 %v4468_v2, %s4699_s24  ;;  %v4470_v5 = vpop.eup %4469 }
 0x7a5   :  { %v1252_v7 = vadd.f32 1.0, %v4470_v5 }
 0x7a7   :  { %4471 = vrcp.f32 %v1252_v7 }
 0x7b1   :  { %v4472_v8 = vpop.eup %4471 }
 0x816   :  { %v1269_v9 = vpop.permute.xlu0 %1268 }
 0x817   :  { %v1271_v6 = vmul.f32 %v4472_v8, %v1269_v9 }
 0x819   :  { %1273 = vrot.lane.b32.xlu1 %v1271_v6, %s4700_s8 }
 0x88b   :  { %v1274_v10 = vpop.permute.xlu1 %1273 }
 0x88c   :  { %3907 = vmatmul.mubr.msk.f32.vlgmr.msra.gmra.mrb[16].mxu0 %vm310_vm2, %v1274_v10  ;;  %3918 = vmatmul.mubr.msk.f32.vlgmr.msra.gmra.mrb[16].mxu1 %vm310_vm2, %v1274_v10 }
 0x88d   :  { %4254 = vmatpush3.bf16.msra.mxu0 %v4960_v20  ;;  %4260 = vmatpush3.bf16.msra.mxu1 %v5090_v27 }
 0x88e   :  { %4255 = vmatprep.subr.bf16.mxu0 %v4696_v13  ;;  %4261 = vmatprep.subr.bf16.mxu1 %v4696_v13 }
 0x88f   :  { %3928 = vmatprep.mubr.msk.f32.mxu0 %vm4697_vm3, %v4698_v16  ;;  %3939 = vmatprep.mubr.msk.f32.mxu1 %vm4697_vm3, %v4698_v16 }
 0x891   :  { %4257 = vmatpush3.bf16.msra.mxu0 %v4971_v23  ;;  %4263 = vmatpush3.bf16.msra.mxu1 %v5094_v29 }
 0x892   :  { %4264 = vmatprep.subr.bf16.mxu0 %v4696_v13  ;;  %4270 = vmatprep.subr.bf16.mxu1 %v4696_v13 }
 0x894   :  { %3929 = vmatmul.mubr.msk.f32.vlgmr.msra.gmra.mrb[18].mxu0 %vm310_vm2, %v1274_v10  ;;  %3940 = vmatmul.mubr.msk.f32.vlgmr.msra.gmra.mrb[18].mxu1 %vm310_vm2, %v1274_v10 }
 0x895   :  { %4266 = vmatpush3.bf16.msra.mxu0 %v4942_v14  ;;  %4272 = vmatpush3.bf16.msra.mxu1 %v5062_v62 }
 0x896   :  { %4267 = vmatprep.subr.bf16.mxu0 %v4696_v13  ;;  %4273 = vmatprep.subr.bf16.mxu1 %v4696_v13 }
 0x897   :  { %3950 = vmatprep.mubr.msk.f32.mxu0 %vm4697_vm3, %v4698_v16  ;;  %3961 = vmatprep.mubr.msk.f32.mxu1 %vm4697_vm3, %v4698_v16 }
 0x899   :  { %4269 = vmatpush3.bf16.msra.mxu0 %v4950_v17  ;;  %4275 = vmatpush3.bf16.msra.mxu1 %v5075_v41 }
 0x89a   :  { %4276 = vmatprep.subr.bf16.mxu0 %v4696_v13  ;;  %4282 = vmatprep.subr.bf16.mxu1 %v4696_v13 }
 0x95f   :  { %v1343_v34 = vpop.f32.mrb[16].mxu0  ;;  %v1420_v11 = vpop.f32.mrb[16].mxu1 }
 0x960   :  { %v3908_v42 = vpop.f32.mrb[17].mxu0  ;;  %v3919_v12 = vpop.f32.mrb[17].mxu1  ;;  %v1347_v24 = vadd.f32 %v1343_v34, %v5112_v44 }
 0x962   :  { %v3538_v25 = vmul.f32 -1.442695, %v1347_v24 }
 0x967   :  { %v1501_v15 = vpop.f32.mrb[18].mxu0  ;;  %v1577_v18 = vpop.f32.mrb[18].mxu1 }
 0x968   :  { %v3941_v19 = vpop.f32.mrb[19].mxu1  ;;  %1506 = vrot.lane.b32.xlu0 %v1501_v15, %s4699_s24  ;;  %v3930_v21 = vpop.f32.mrb[19].mxu0 }
 0x96c   :  { %1425 = vrot.lane.b32.xlu0 %v1420_v11, %s4700_s8 }
 0x970   :  { %1582 = vrot.lane.b32.xlu0 %v1577_v18, %s4701_s19 }
 0x9da   :  { %v1507_v51 = vpop.permute.xlu0 %1506 }
 0x9db   :  { %v1509_v22 = vadd.f32 %v1507_v51, %v5112_v44 }
 0x9dd   :  { %4473 = vtanh.f32 %v1509_v22 }
 0x9de   :  { %4475 = vpow2.f32 %v3538_v25  ;;  %v1426_v36 = vpop.permute.xlu0 %1425 }
 0x9df   :  { %v1428_v37 = vadd.f32 %v1426_v36, %v5112_v44 }
 0x9e1   :  { %v3540_v38 = vmul.f32 -1.442695, %v1428_v37 }
 0x9e2   :  { %v1583_v56 = vpop.permute.xlu0 %1582 }
 0x9e3   :  { %v1585_v57 = vadd.f32 %v1583_v56, %v5112_v44 }
 0x9e5   :  { %v3543_v26 = vmul.f32 -1.442695, %v1585_v57 }
 0x9e7   :  { %v4474_v52 = vpop.eup %4473 }
 0x9e8   :  { %1594 = vrot.lane.b32.xlu1 %v4474_v52, %s4699_s24  ;;  %v4476_v28 = vpop.eup %4475 }
 0x9e9   :  { %v1351_v59 = vadd.f32 1.0, %v4476_v28 }
 0x9eb   :  { %4477 = vrcp.f32 %v1351_v59 }
 0x9ec   :  { %4479 = vpow2.f32 %v3540_v38 }
 0x9f5   :  { %v4478_v30 = vpop.eup %4477 }
 0x9f6   :  { %v4480_v39 = vpop.eup %4479 }
 0x9f7   :  { %v1432_v43 = vadd.f32 1.0, %v4480_v39 }
 0x9f9   :  { %4481 = vrcp.f32 %v1432_v43 }
 0xa03   :  { %v4482_v45 = vpop.eup %4481 }
 0xa04   :  { %v1592_v47 = vmul.f32 %v4482_v45, %v5169_v1 }
 0xa5a   :  { %v1595_v31 = vpop.permute.xlu1 %1594 }
 0xa5b   :  { %v1597_v35 = vmul.f32 %v4478_v30, %v1595_v31 }
 0xa5d   :  { %1599 = vrot.lane.b32.xlu1 %v1597_v35, %s4700_s8 }
 0xacf   :  { %v1600_v49 = vpop.permute.xlu1 %1599 }
 0xad0   :  { %v5212_v53 = vadd.f32 %v1600_v49, %v1592_v47 }
 0xad2   :  { %4483 = vtanh.f32 %v5212_v53 }
 0xad3   :  { %4485 = vpow2.f32 %v3543_v26 }
 0xadc   :  { %v4484_v55 = vpop.eup %4483 }
 0xadd   :  { %1605 = vrot.lane.b32.xlu1 %v4484_v55, %s4699_s24  ;;  %v4486_v58 = vpop.eup %4485 }
 0xade   :  { %v1589_v60 = vadd.f32 1.0, %v4486_v58 }
 0xae0   :  { %4487 = vrcp.f32 %v1589_v60 }
 0xaea   :  { %v4488_v61 = vpop.eup %4487 }
 0xb4f   :  { %v1606_v63 = vpop.permute.xlu1 %1605 }
 0xb50   :  { %v1608_v33 = vmul.f32 %v4488_v61, %v1606_v63 }
 0xb52   :  { %1610 = vrot.lane.b32.xlu0 %v1608_v33, %s4700_s8 }
 0xbc4   :  { %v1611_v0 = vpop.permute.xlu0 %1610 }
 0xbc5   :  { %3951 = vmatmul.mubr.msk.f32.vlgmr.msra.gmra.mrb[20].mxu0 %vm310_vm2, %v1611_v0  ;;  %3962 = vmatmul.mubr.msk.f32.vlgmr.msra.gmra.mrb[20].mxu1 %vm310_vm2, %v1611_v0 }
 0xbc6   :  { %4278 = vmatpush3.bf16.msra.mxu0 %v4960_v20  ;;  %4284 = vmatpush3.bf16.msra.mxu1 %v5090_v27 }
 0xbc7   :  { %4279 = vmatprep.subr.bf16.mxu0 %v4696_v13  ;;  %4285 = vmatprep.subr.bf16.mxu1 %v4696_v13 }
 0xbc8   :  { %3972 = vmatprep.mubr.msk.f32.mxu0 %vm4697_vm3, %v4698_v16  ;;  %3983 = vmatprep.mubr.msk.f32.mxu1 %vm4697_vm3, %v4698_v16 }
 0xbca   :  { %4281 = vmatpush3.bf16.msra.mxu0 %v4971_v23  ;;  %4287 = vmatpush3.bf16.msra.mxu1 %v5094_v29 }
 0xbcb   :  { %4288 = vmatprep.subr.bf16.mxu0 %v4696_v13  ;;  %4294 = vmatprep.subr.bf16.mxu1 %v4696_v13 }
 0xbcd   :  { %3973 = vmatmul.mubr.msk.f32.vlgmr.msra.gmra.mrb[22].mxu0 %vm310_vm2, %v1611_v0  ;;  %3984 = vmatmul.mubr.msk.f32.vlgmr.msra.gmra.mrb[22].mxu1 %vm310_vm2, %v1611_v0 }
 0xbce   :  { %4290 = vmatpush3.bf16.msra.mxu0 %v4942_v14  ;;  %4296 = vmatpush3.bf16.msra.mxu1 %v5062_v62 }
 0xbcf   :  { %4291 = vmatprep.subr.bf16.mxu0 %v4696_v13  ;;  %4297 = vmatprep.subr.bf16.mxu1 %v4696_v13 }
 0xbd0   :  { %3994 = vmatprep.mubr.msk.f32.mxu0 %vm4697_vm3, %v4698_v16  ;;  %4005 = vmatprep.mubr.msk.f32.mxu1 %vm4697_vm3, %v4698_v16 }
 0xbd2   :  { %4293 = vmatpush3.bf16.msra.mxu0 %v4950_v17  ;;  %4299 = vmatpush3.bf16.msra.mxu1 %v5075_v41 }
 0xbd3   :  { %4300 = vmatprep.subr.bf16.mxu0 %v4696_v13  ;;  %4306 = vmatprep.subr.bf16.mxu1 %v4696_v13 }
 0xc98   :  { %v1680_v44 = vpop.f32.mrb[20].mxu0  ;;  %v1757_v1 = vpop.f32.mrb[20].mxu1 }
 0xc99   :  { %v3952_v2 = vpop.f32.mrb[21].mxu0  ;;  %v3963_v32 = vpop.f32.mrb[21].mxu1  ;;  %v1684_v10 = vadd.f32 %v1680_v44, %v5110_v40 }
 0xc9b   :  { %v3545_v34 = vmul.f32 -1.442695, %v1684_v10 }
 0xca0   :  { %v1838_v3 = vpop.f32.mrb[22].mxu0  ;;  %v1914_v4 = vpop.f32.mrb[22].mxu1 }
 0xca1   :  { %v3985_v5 = vpop.f32.mrb[23].mxu1  ;;  %1843 = vrot.lane.b32.xlu1 %v1838_v3, %s4699_s24  ;;  %v3974_v7 = vpop.f32.mrb[23].mxu0 }
 0xca5   :  { %1762 = vrot.lane.b32.xlu1 %v1757_v1, %s4700_s8 }
 0xca9   :  { %1919 = vrot.lane.b32.xlu1 %v1914_v4, %s4701_s19 }
 0xd13   :  { %v1844_v8 = vpop.permute.xlu1 %1843 }
 0xd14   :  { %v1846_v9 = vadd.f32 %v1844_v8, %v5110_v40 }
 0xd16   :  { %4489 = vtanh.f32 %v1846_v9 }
 0xd17   :  { %4491 = vpow2.f32 %v3545_v34  ;;  %v1763_v19 = vpop.permute.xlu1 %1762 }
 0xd18   :  { %v1765_v21 = vadd.f32 %v1763_v19, %v5110_v40 }
 0xd1a   :  { %v3547_v51 = vmul.f32 -1.442695, %v1765_v21 }
 0xd1b   :  { %v1920_v31 = vpop.permute.xlu1 %1919 }
 0xd1c   :  { %v1922_v35 = vadd.f32 %v1920_v31, %v5110_v40 }
 0xd1e   :  { %v3550_v36 = vmul.f32 -1.442695, %v1922_v35 }
 0xd20   :  { %v4490_v6 = vpop.eup %4489 }
 0xd21   :  { %1931 = vrot.lane.b32.xlu0 %v4490_v6, %s4699_s24  ;;  %v4492_v11 = vpop.eup %4491 }
 0xd22   :  { %v1688_v42 = vadd.f32 1.0, %v4492_v11 }
 0xd24   :  { %4493 = vrcp.f32 %v1688_v42 }
 0xd25   :  { %4495 = vpow2.f32 %v3547_v51 }
 0xd2e   :  { %v4494_v12 = vpop.eup %4493 }
 0xd2f   :  { %v4496_v22 = vpop.eup %4495 }
 0xd30   :  { %v1769_v52 = vadd.f32 1.0, %v4496_v22 }
 0xd32   :  { %4497 = vrcp.f32 %v1769_v52 }
 0xd3c   :  { %v4498_v24 = vpop.eup %4497 }
 0xd3d   :  { %v1929_v25 = vmul.f32 %v4498_v24, %v5212_v53 }
 0xd93   :  { %v1932_v15 = vpop.permute.xlu0 %1931 }
 0xd94   :  { %v1934_v18 = vmul.f32 %v4494_v12, %v1932_v15 }
 0xd96   :  { %1936 = vrot.lane.b32.xlu0 %v1934_v18, %s4700_s8 }
 0xe08   :  { %v1937_v28 = vpop.permute.xlu0 %1936 }
 0xe09   :  { %v5255_v59 = vadd.f32 %v1937_v28, %v1929_v25 }
 0xe0b   :  { %4499 = vtanh.f32 %v5255_v59 }
 0xe0c   :  { %4501 = vpow2.f32 %v3550_v36 }
 0xe15   :  { %v4500_v30 = vpop.eup %4499 }
 0xe16   :  { %1942 = vrot.lane.b32.xlu0 %v4500_v30, %s4699_s24  ;;  %v4502_v37 = vpop.eup %4501 }
 0xe17   :  { %v1926_v38 = vadd.f32 1.0, %v4502_v37 }
 0xe19   :  { %4503 = vrcp.f32 %v1926_v38 }
 0xe23   :  { %v4504_v39 = vpop.eup %4503 }
 0xe88   :  { %v1943_v43 = vpop.permute.xlu0 %1942 }
 0xe89   :  { %v1945_v45 = vmul.f32 %v4504_v39, %v1943_v43 }
 0xe8b   :  { %1947 = vrot.lane.b32.xlu1 %v1945_v45, %s4700_s8 }
 0xefd   :  { %v1948_v47 = vpop.permute.xlu1 %1947 }
 0xefe   :  { %3995 = vmatmul.mubr.msk.f32.vlgmr.msra.gmra.mrb[24].mxu0 %vm310_vm2, %v1948_v47  ;;  %4006 = vmatmul.mubr.msk.f32.vlgmr.msra.gmra.mrb[24].mxu1 %vm310_vm2, %v1948_v47 }
 0xeff   :  { %4302 = vmatpush3.bf16.msra.mxu0 %v4960_v20  ;;  %4308 = vmatpush3.bf16.msra.mxu1 %v5090_v27 }
 0xf00   :  { %4303 = vmatprep.subr.bf16.mxu0 %v4696_v13  ;;  %4309 = vmatprep.subr.bf16.mxu1 %v4696_v13 }
 0xf01   :  { %4016 = vmatprep.mubr.msk.f32.mxu0 %vm4697_vm3, %v4698_v16  ;;  %4027 = vmatprep.mubr.msk.f32.mxu1 %vm4697_vm3, %v4698_v16 }
 0xf03   :  { %4305 = vmatpush3.bf16.msra.mxu0 %v4971_v23  ;;  %4311 = vmatpush3.bf16.msra.mxu1 %v5094_v29 }
 0xf04   :  { %4312 = vmatprep.subr.bf16.mxu0 %v4696_v13  ;;  %4318 = vmatprep.subr.bf16.mxu1 %v4696_v13 }
 0xf06   :  { %4017 = vmatmul.mubr.msk.f32.vlgmr.msra.gmra.mrb[26].mxu0 %vm310_vm2, %v1948_v47  ;;  %4028 = vmatmul.mubr.msk.f32.vlgmr.msra.gmra.mrb[26].mxu1 %vm310_vm2, %v1948_v47 }
 0xf07   :  { %4314 = vmatpush3.bf16.msra.mxu0 %v4942_v14  ;;  %4320 = vmatpush3.bf16.msra.mxu1 %v5062_v62 }
 0xf08   :  { %4315 = vmatprep.subr.bf16.mxu0 %v4696_v13  ;;  %4321 = vmatprep.subr.bf16.mxu1 %v4696_v13 }
 0xf09   :  { %4038 = vmatprep.mubr.msk.f32.mxu0 %vm4697_vm3, %v4698_v16  ;;  %4049 = vmatprep.mubr.msk.f32.mxu1 %vm4697_vm3, %v4698_v16 }
 0xf0b   :  { %4317 = vmatpush3.bf16.msra.mxu0 %v4950_v17  ;;  %4323 = vmatpush3.bf16.msra.mxu1 %v5075_v41 }
 0xf0c   :  { %4324 = vmatprep.subr.bf16.mxu0 %v4696_v13  ;;  %4330 = vmatprep.subr.bf16.mxu1 %v4696_v13 }
 0xfd1   :  { %v2017_v40 = vpop.f32.mrb[24].mxu0  ;;  %v2094_v49 = vpop.f32.mrb[24].mxu1 }
 0xfd2   :  { %v3996_v53 = vpop.f32.mrb[25].mxu0  ;;  %v4007_v55 = vpop.f32.mrb[25].mxu1  ;;  %v2021_v33 = vadd.f32 %v2017_v40, %v5116_v48 }
 0xfd4   :  { %v3552_v0 = vmul.f32 -1.442695, %v2021_v33 }
 0xfd9   :  { %v2175_v56 = vpop.f32.mrb[26].mxu0  ;;  %v2251_v57 = vpop.f32.mrb[26].mxu1 }
 0xfda   :  { %v4029_v26 = vpop.f32.mrb[27].mxu1  ;;  %2180 = vrot.lane.b32.xlu0 %v2175_v56, %s4699_s24  ;;  %v4018_v58 = vpop.f32.mrb[27].mxu0 }
 0xfde   :  { %2099 = vrot.lane.b32.xlu0 %v2094_v49, %s4700_s8 }
 0xfe2   :  { %2256 = vrot.lane.b32.xlu0 %v2251_v57, %s4701_s19 }
0x104c   :  { %v2181_v60 = vpop.permute.xlu0 %2180 }
0x104d   :  { %v2183_v61 = vadd.f32 %v2181_v60, %v5116_v48 }
0x104f   :  { %4505 = vtanh.f32 %v2183_v61 }
0x1050   :  { %4507 = vpow2.f32 %v3552_v0  ;;  %v2100_v4 = vpop.permute.xlu0 %2099 }
0x1051   :  { %v2102_v5 = vadd.f32 %v2100_v4, %v5116_v48 }
0x1053   :  { %v3554_v7 = vmul.f32 -1.442695, %v2102_v5 }
0x1054   :  { %v2257_v12 = vpop.permute.xlu0 %2256 }
0x1055   :  { %v2259_v15 = vadd.f32 %v2257_v12, %v5116_v48 }
0x1057   :  { %v3557_v18 = vmul.f32 -1.442695, %v2259_v15 }
0x1059   :  { %v4506_v63 = vpop.eup %4505 }
0x105a   :  { %2268 = vrot.lane.b32.xlu1 %v4506_v63, %s4699_s24  ;;  %v4508_v44 = vpop.eup %4507 }
0x105b   :  { %v2025_v1 = vadd.f32 1.0, %v4508_v44 }
0x105d   :  { %4509 = vrcp.f32 %v2025_v1 }
0x105e   :  { %4511 = vpow2.f32 %v3554_v7 }
0x1067   :  { %v4510_v2 = vpop.eup %4509 }
0x1068   :  { %v4512_v8 = vpop.eup %4511 }
0x1069   :  { %v2106_v9 = vadd.f32 1.0, %v4512_v8 }
0x106b   :  { %4513 = vrcp.f32 %v2106_v9 }
0x1075   :  { %v4514_v6 = vpop.eup %4513 }
0x1076   :  { %v2266_v10 = vmul.f32 %v4514_v6, %v5255_v59 }
0x10cc   :  { %v2269_v32 = vpop.permute.xlu1 %2268 }
0x10cd   :  { %v2271_v3 = vmul.f32 %v4510_v2, %v2269_v32 }
0x10cf   :  { %2273 = vrot.lane.b32.xlu1 %v2271_v3, %s4700_s8 }
0x1141   :  { %v2274_v34 = vpop.permute.xlu1 %2273 }
0x1142   :  { %v5298_v11 = vadd.f32 %v2274_v34, %v2266_v10 }
0x1144   :  { %4515 = vtanh.f32 %v5298_v11 }
0x1145   :  { %4517 = vpow2.f32 %v3557_v18 }
0x114e   :  { %v4516_v42 = vpop.eup %4515 }
0x114f   :  { %2279 = vrot.lane.b32.xlu1 %v4516_v42, %s4699_s24  ;;  %v4518_v19 = vpop.eup %4517 }
0x1150   :  { %v2263_v21 = vadd.f32 1.0, %v4518_v19 }
0x1152   :  { %4519 = vrcp.f32 %v2263_v21 }
0x115c   :  { %v4520_v51 = vpop.eup %4519 }
0x11c1   :  { %v2280_v22 = vpop.permute.xlu1 %2279 }
0x11c2   :  { %v2282_v52 = vmul.f32 %v4520_v51, %v2280_v22 }
0x11c4   :  { %2284 = vrot.lane.b32.xlu0 %v2282_v52, %s4700_s8 }
0x1236   :  { %v2285_v24 = vpop.permute.xlu0 %2284 }
0x1237   :  { %4039 = vmatmul.mubr.msk.f32.vlgmr.msra.gmra.mrb[28].mxu0 %vm310_vm2, %v2285_v24  ;;  %4050 = vmatmul.mubr.msk.f32.vlgmr.msra.gmra.mrb[28].mxu1 %vm310_vm2, %v2285_v24 }
0x1238   :  { %4326 = vmatpush3.bf16.msra.mxu0 %v4960_v20  ;;  %4332 = vmatpush3.bf16.msra.mxu1 %v5090_v27 }
0x1239   :  { %4327 = vmatprep.subr.bf16.mxu0 %v4696_v13  ;;  %4333 = vmatprep.subr.bf16.mxu1 %v4696_v13 }
0x123a   :  { %4060 = vmatprep.mubr.msk.f32.mxu0 %vm4697_vm3, %v4698_v16  ;;  %4071 = vmatprep.mubr.msk.f32.mxu1 %vm4697_vm3, %v4698_v16 }
0x123c   :  { %4329 = vmatpush3.bf16.msra.mxu0 %v4971_v23  ;;  %4335 = vmatpush3.bf16.msra.mxu1 %v5094_v29 }
0x123d   :  { %4336 = vmatprep.subr.bf16.mxu0 %v4696_v13  ;;  %4342 = vmatprep.subr.bf16.mxu1 %v4696_v13 }
0x123f   :  { %4061 = vmatmul.mubr.msk.f32.vlgmr.msra.gmra.mrb[30].mxu0 %vm310_vm2, %v2285_v24  ;;  %4072 = vmatmul.mubr.msk.f32.vlgmr.msra.gmra.mrb[30].mxu1 %vm310_vm2, %v2285_v24 }
0x1240   :  { %4338 = vmatpush3.bf16.msra.mxu0 %v4942_v14  ;;  %4344 = vmatpush3.bf16.msra.mxu1 %v5062_v62 }
0x1241   :  { %4339 = vmatprep.subr.bf16.mxu0 %v4696_v13  ;;  %4345 = vmatprep.subr.bf16.mxu1 %v4696_v13 }
0x1242   :  { %4082 = vmatprep.mubr.msk.f32.mxu0 %vm4697_vm3, %v4698_v16  ;;  %4093 = vmatprep.mubr.msk.f32.mxu1 %vm4697_vm3, %v4698_v16 }
0x1244   :  { %4341 = vmatpush3.bf16.msra.mxu0 %v4950_v17  ;;  %4347 = vmatpush3.bf16.msra.mxu1 %v5075_v41 }
0x1245   :  { %4348 = vmatprep.subr.bf16.mxu0 %v4696_v13  ;;  %4354 = vmatprep.subr.bf16.mxu1 %v4696_v13 }
0x130a   :  { %v2354_v48 = vpop.f32.mrb[28].mxu0  ;;  %v2431_v25 = vpop.f32.mrb[28].mxu1 }
0x130b   :  { %v4040_v28 = vpop.f32.mrb[29].mxu0  ;;  %v4051_v59 = vpop.f32.mrb[29].mxu1  ;;  %v2358_v43 = vadd.f32 %v2354_v48, %v5114_v46 }
0x130d   :  { %v3559_v45 = vmul.f32 -1.442695, %v2358_v43 }
0x1312   :  { %v2512_v30 = vpop.f32.mrb[30].mxu0  ;;  %v2588_v31 = vpop.f32.mrb[30].mxu1 }
0x1313   :  { %v4073_v35 = vpop.f32.mrb[31].mxu1  ;;  %2517 = vrot.lane.b32.xlu1 %v2512_v30, %s4699_s24  ;;  %v4062_v36 = vpop.f32.mrb[31].mxu0 }
0x1317   :  { %2436 = vrot.lane.b32.xlu1 %v2431_v25, %s4700_s8 }
0x131b   :  { %2593 = vrot.lane.b32.xlu1 %v2588_v31, %s4701_s19 }
0x1385   :  { %v2518_v37 = vpop.permute.xlu1 %2517 }
0x1386   :  { %v2520_v38 = vadd.f32 %v2518_v37, %v5114_v46 }
0x1388   :  { %4521 = vtanh.f32 %v2520_v38 }
0x1389   :  { %4523 = vpow2.f32 %v3559_v45  ;;  %v2437_v56 = vpop.permute.xlu1 %2436 }
0x138a   :  { %v2439_v57 = vadd.f32 %v2437_v56, %v5114_v46 }
0x138c   :  { %v3561_v26 = vmul.f32 -1.442695, %v2439_v57 }
0x138d   :  { %v2594_v1 = vpop.permute.xlu1 %2593 }
0x138e   :  { %v2596_v2 = vadd.f32 %v2594_v1, %v5114_v46 }
0x1390   :  { %v3564_v32 = vmul.f32 -1.442695, %v2596_v2 }
0x1392   :  { %v4522_v39 = vpop.eup %4521 }
0x1393   :  { %2605 = vrot.lane.b32.xlu0 %v4522_v39, %s4699_s24  ;;  %v4524_v47 = vpop.eup %4523 }
0x1394   :  { %v2362_v40 = vadd.f32 1.0, %v4524_v47 }
0x1396   :  { %4525 = vrcp.f32 %v2362_v40 }
0x1397   :  { %4527 = vpow2.f32 %v3561_v26 }
0x13a0   :  { %v4526_v49 = vpop.eup %4525 }
0x13a1   :  { %v4528_v58 = vpop.eup %4527 }
0x13a2   :  { %v2443_v60 = vadd.f32 1.0, %v4528_v58 }
0x13a4   :  { %4529 = vrcp.f32 %v2443_v60 }
0x13ae   :  { %v4530_v61 = vpop.eup %4529 }
0x13af   :  { %v2603_v63 = vmul.f32 %v4530_v61, %v5298_v11 }
0x1405   :  { %v2606_v53 = vpop.permute.xlu0 %2605 }
0x1406   :  { %v2608_v55 = vmul.f32 %v4526_v49, %v2606_v53 }
0x1408   :  { %2610 = vrot.lane.b32.xlu0 %v2608_v55, %s4700_s8 }
0x147a   :  { %v2611_v33 = vpop.permute.xlu0 %2610 }
0x147b   :  { %v5341_v0 = vadd.f32 %v2611_v33, %v2603_v63 }
0x147d   :  { %4531 = vtanh.f32 %v5341_v0 }
0x147e   :  { %4533 = vpow2.f32 %v3564_v32 }
0x1487   :  { %v4532_v44 = vpop.eup %4531 }
0x1488   :  { %2616 = vrot.lane.b32.xlu0 %v4532_v44, %s4699_s24  ;;  %v4534_v3 = vpop.eup %4533 }
0x1489   :  { %v2600_v4 = vadd.f32 1.0, %v4534_v3 }
0x148b   :  { %4535 = vrcp.f32 %v2600_v4 }
0x1495   :  { %v4536_v5 = vpop.eup %4535 }
0x14fa   :  { %v2617_v7 = vpop.permute.xlu0 %2616 }
0x14fb   :  { %v2619_v8 = vmul.f32 %v4536_v5, %v2617_v7 }
0x14fd   :  { %2621 = vrot.lane.b32.xlu1 %v2619_v8, %s4700_s8 }
0x156f   :  { %v2622_v9 = vpop.permute.xlu1 %2621 }
0x1570   :  { %4083 = vmatmul.mubr.msk.f32.vlgmr.msra.gmra.mrb[32].mxu0 %vm310_vm2, %v2622_v9  ;;  %4094 = vmatmul.mubr.msk.f32.vlgmr.msra.gmra.mrb[32].mxu1 %vm310_vm2, %v2622_v9 }
0x1571   :  { %4350 = vmatpush3.bf16.msra.mxu0 %v4960_v20  ;;  %4356 = vmatpush3.bf16.msra.mxu1 %v5090_v27 }
0x1572   :  { %4351 = vmatprep.subr.bf16.mxu0 %v4696_v13  ;;  %4357 = vmatprep.subr.bf16.mxu1 %v4696_v13 }
0x1573   :  { %4104 = vmatprep.mubr.msk.f32.mxu0 %vm4697_vm3, %v4698_v16  ;;  %4115 = vmatprep.mubr.msk.f32.mxu1 %vm4697_vm3, %v4698_v16 }
0x1575   :  { %4353 = vmatpush3.bf16.msra.mxu0 %v4971_v23  ;;  %4359 = vmatpush3.bf16.msra.mxu1 %v5094_v29 }
0x1576   :  { %4360 = vmatprep.subr.bf16.mxu0 %v4696_v13  ;;  %4366 = vmatprep.subr.bf16.mxu1 %v4696_v13 }
0x1578   :  { %4105 = vmatmul.mubr.msk.f32.vlgmr.msra.gmra.mrb[34].mxu0 %vm310_vm2, %v2622_v9  ;;  %4116 = vmatmul.mubr.msk.f32.vlgmr.msra.gmra.mrb[34].mxu1 %vm310_vm2, %v2622_v9 }
0x1579   :  { %4362 = vmatpush3.bf16.msra.mxu0 %v4942_v14  ;;  %4368 = vmatpush3.bf16.msra.mxu1 %v5062_v62 }
0x157a   :  { %4363 = vmatprep.subr.bf16.mxu0 %v4696_v13  ;;  %4369 = vmatprep.subr.bf16.mxu1 %v4696_v13 }
0x157b   :  { %4126 = vmatprep.mubr.msk.f32.mxu0 %vm4697_vm3, %v4698_v16  ;;  %4137 = vmatprep.mubr.msk.f32.mxu1 %vm4697_vm3, %v4698_v16 }
0x157d   :  { %4365 = vmatpush3.bf16.msra.mxu0 %v4950_v17  ;;  %4371 = vmatpush3.bf16.msra.mxu1 %v5075_v41 }
0x157e   :  { %4372 = vmatprep.subr.bf16.mxu0 %v4696_v13  ;;  %4378 = vmatprep.subr.bf16.mxu1 %v4696_v13 }
0x1643   :  { %v2691_v14 = vpop.f32.mrb[32].mxu0  ;;  %v2768_v62 = vpop.f32.mrb[32].mxu1 }
0x1644   :  { %v4084_v46 = vpop.f32.mrb[33].mxu0  ;;  %v4095_v6 = vpop.f32.mrb[33].mxu1  ;;  %v2695_v15 = vadd.f32 %v2691_v14, %v5120_v54 }
0x1645   :  { %v3294_v46 = vld [vmem:[#allocation9] sm:$0xff]  ;;  %v3295_v6 = vld [vmem:[#allocation9 + $0x8] sm:$0xff] }
0x1646   :  { %v3566_v18 = vmul.f32 -1.442695, %v2695_v15 }
0x164b   :  { %v2849_v10 = vpop.f32.mrb[34].mxu0  ;;  %v2925_v34 = vpop.f32.mrb[34].mxu1 }
0x164c   :  { %v4117_v11 = vpop.f32.mrb[35].mxu1  ;;  %2854 = vrot.lane.b32.xlu0 %v2849_v10, %s4699_s24  ;;  %v4106_v42 = vpop.f32.mrb[35].mxu0  ;;  %v3296_v10 = vld [vmem:[#allocation9 + $0x10] sm:$0xff] }
0x164d   :  { %v3297_v11 = vld [vmem:[#allocation9 + $0x18] sm:$0xff] }
0x164e   :  { %v4388_v42 = vpack.c.bf16 %v3297_v11, %v3296_v10 }
0x1650   :  { %2773 = vrot.lane.b32.xlu0 %v2768_v62, %s4700_s8 }
0x1654   :  { %2930 = vrot.lane.b32.xlu0 %v2925_v34, %s4701_s19  ;;  %v4385_v34 = vpack.c.bf16 %v3295_v6, %v3294_v46 }
0x16be   :  { %v2855_v17 = vpop.permute.xlu0 %2854 }
0x16bf   :  { %v2857_v41 = vadd.f32 %v2855_v17, %v5120_v54 }
0x16c1   :  { %4537 = vtanh.f32 %v2857_v41 }
0x16c2   :  { %4539 = vpow2.f32 %v3566_v18  ;;  %v2774_v24 = vpop.permute.xlu0 %2773 }
0x16c3   :  { %v2776_v48 = vadd.f32 %v2774_v24, %v5120_v54  ;;  %v3579_v24 = vld [vmem:[%s5468_s12] ss:$0 sm:$0xff] }
0x16c5   :  { %v3568_v25 = vmul.f32 -1.442695, %v2776_v48 }
0x16c6   :  { %v2931_v38 = vpop.permute.xlu0 %2930 }
0x16c7   :  { %v2933_v39 = vadd.f32 %v2931_v38, %v5120_v54  ;;  %v3415_v38 = vld [vmem:[%s5471_s15 + $0x8] sm:$0xff] }
0x16c9   :  { %v3571_v43 = vmul.f32 -1.442695, %v2933_v39  ;;  %v3416_v39 = vld [vmem:[%s5471_s15 + $0x10] sm:$0xff] }
0x16cb   :  { %v4538_v12 = vpop.eup %4537 }
0x16cc   :  { %2942 = vrot.lane.b32.xlu1 %v4538_v12, %s4699_s24  ;;  %v4540_v19 = vpop.eup %4539 }
0x16cd   :  { %v2699_v21 = vadd.f32 1.0, %v4540_v19 }
0x16cf   :  { %4541 = vrcp.f32 %v2699_v21 }
0x16d0   :  { %4543 = vpow2.f32 %v3568_v25 }
0x16d9   :  { %v4542_v51 = vpop.eup %4541 }
0x16da   :  { %v4544_v28 = vpop.eup %4543 }
0x16db   :  { %v2780_v59 = vadd.f32 1.0, %v4544_v28 }
0x16dd   :  { %4545 = vrcp.f32 %v2780_v59 }
0x16e7   :  { %v4546_v30 = vpop.eup %4545 }
0x16e8   :  { %v2940_v31 = vmul.f32 %v4546_v30, %v5341_v0 }
0x173e   :  { %v2943_v22 = vpop.permute.xlu1 %2942 }
0x173f   :  { %v2945_v52 = vmul.f32 %v4542_v51, %v2943_v22 }
0x1741   :  { %2947 = vrot.lane.b32.xlu1 %v2945_v52, %s4700_s8 }
0x17b3   :  { %v2948_v35 = vpop.permute.xlu1 %2947 }
0x17b4   :  { %v5384_v36 = vadd.f32 %v2948_v35, %v2940_v31 }
0x17b6   :  { %4547 = vtanh.f32 %v5384_v36 }
0x17b7   :  { %4549 = vpow2.f32 %v3571_v43 }
0x17c0   :  { %v4548_v37 = vpop.eup %4547 }
0x17c1   :  { %2953 = vrot.lane.b32.xlu1 %v4548_v37, %s4699_s24  ;;  %v4550_v45 = vpop.eup %4549  ;;  %v3414_v37 = vld [vmem:[%s5471_s15] sm:$0xff] }
0x17c2   :  { %v2937_v47 = vadd.f32 1.0, %v4550_v45  ;;  %v4391_v43 = vpack.c.bf16 %v3415_v38, %v3414_v37  ;;  %v3417_v45 = vld [vmem:[%s5471_s15 + $0x18] sm:$0xff] }
0x17c4   :  { %4551 = vrcp.f32 %v2937_v47  ;;  %v4394_v47 = vpack.c.bf16 %v3417_v45, %v3416_v39 }
0x17ce   :  { %v4552_v40 = vpop.eup %4551 }
0x1833   :  { %v2954_v49 = vpop.permute.xlu1 %2953 }
0x1834   :  { %v2956_v53 = vmul.f32 %v4552_v40, %v2954_v49 }
0x1836   :  { %2958 = vrot.lane.b32.xlu0 %v2956_v53, %s4700_s8 }
0x18a8   :  { %v2959_v55 = vpop.permute.xlu0 %2958 }
0x18a9   :  { %4127 = vmatmul.mubr.msk.f32.vlgmr.msra.gmra.mrb[36].mxu0 %vm310_vm2, %v2959_v55  ;;  %4138 = vmatmul.mubr.msk.f32.vlgmr.msra.gmra.mrb[36].mxu1 %vm310_vm2, %v2959_v55 }
0x18aa   :  { %4374 = vmatpush3.bf16.msra.mxu0 %v4960_v20  ;;  %4380 = vmatpush3.bf16.msra.mxu1 %v5090_v27 }
0x18ab   :  { %4375 = vmatprep.subr.bf16.mxu0 %v4696_v13  ;;  %4381 = vmatprep.subr.bf16.mxu1 %v4696_v13 }
0x18ac   :  { %4148 = vmatprep.mubr.msk.f32.mxu0 %vm4697_vm3, %v4698_v16  ;;  %4159 = vmatprep.mubr.msk.f32.mxu1 %vm4697_vm3, %v4698_v16 }
0x18ae   :  { %4377 = vmatpush3.bf16.msra.mxu0 %v4971_v23  ;;  %4383 = vmatpush3.bf16.msra.mxu1 %v5094_v29 }
0x18af   :  { %4384 = vmatprep.subr.bf16.mxu0 %v4696_v13  ;;  %4390 = vmatprep.subr.bf16.mxu1 %v4696_v13 }
0x18b1   :  { %4149 = vmatmul.mubr.msk.f32.vlgmr.msra.gmra.mrb[38].mxu0 %vm310_vm2, %v2959_v55  ;;  %4160 = vmatmul.mubr.msk.f32.vlgmr.msra.gmra.mrb[38].mxu1 %vm310_vm2, %v2959_v55 }
0x18b2   :  { %4170 = vmatprep.mubr.msk.f32.mxu0 %vm4697_vm3, %v4698_v16  ;;  %4181 = vmatprep.mubr.msk.f32.mxu1 %vm4697_vm3, %v4698_v16 }
0x18b3   :  { %4386 = vmatpush3.bf16.msra.mxu0 %v4385_v34  ;;  %4392 = vmatpush3.bf16.msra.mxu1 %v4391_v43 }
0x18b4   :  { %4387 = vmatprep.subr.bf16.mxu0 %v4696_v13  ;;  %4393 = vmatprep.subr.bf16.mxu1 %v4696_v13 }
0x18b7   :  { %4389 = vmatpush3.bf16.msra.mxu0 %v4388_v42  ;;  %4395 = vmatpush3.bf16.msra.mxu1 %v4394_v47 }
0x197c   :  { %v3028_v20 = vpop.f32.mrb[36].mxu0  ;;  %v3105_v27 = vpop.f32.mrb[36].mxu1 }
0x197d   :  { %v4128_v54 = vpop.f32.mrb[37].mxu0  ;;  %v4139_v23 = vpop.f32.mrb[37].mxu1  ;;  %v3032_v16 = vadd.f32 %v3028_v20, %v5118_v50  ;;  %v3581_v20 = vld [vmem:[%s5469_s13] ss:$0 sm:$0xff] }
0x197e   :  { %v3582_v54 = vld [vmem:[%s5470_s14] ss:$0 sm:$0xff] }
0x197f   :  { %v3573_v63 = vmul.f32 -1.442695, %v3032_v16 }
0x1984   :  { %v3186_v56 = vpop.f32.mrb[38].mxu0  ;;  %v3262_v29 = vpop.f32.mrb[38].mxu1 }
0x1985   :  { %v4161_v57 = vpop.f32.mrb[39].mxu1  ;;  %3191 = vrot.lane.b32.xlu1 %v3186_v56, %s4699_s24  ;;  %v4150_v26 = vpop.f32.mrb[39].mxu0 }
0x1989   :  { %3110 = vrot.lane.b32.xlu1 %v3105_v27, %s4700_s8 }
0x198d   :  { %3267 = vrot.lane.b32.xlu1 %v3262_v29, %s4701_s19 }
0x19f7   :  { %v3192_v58 = vpop.permute.xlu1 %3191 }
0x19f8   :  { %v3194_v60 = vadd.f32 %v3192_v58, %v5118_v50 }
0x19fa   :  { %4553 = vtanh.f32 %v3194_v60  ;;  %v3583_v60 = vld [vmem:[%s5472_s16] ss:$0 sm:$0xff] }
0x19fb   :  { %4555 = vpow2.f32 %v3573_v63  ;;  %v3111_v32 = vpop.permute.xlu1 %3110 }
0x19fc   :  { %v3113_v3 = vadd.f32 %v3111_v32, %v5118_v50 }
0x19fe   :  { %v3575_v4 = vmul.f32 -1.442695, %v3113_v3 }
0x19ff   :  { %v3268_v41 = vpop.permute.xlu1 %3267 }
0x1a00   :  { %v3270_v12 = vadd.f32 %v3268_v41, %v5118_v50 }
0x1a02   :  { %v3578_v15 = vmul.f32 -1.442695, %v3270_v12 }
0x1a04   :  { %v4554_v61 = vpop.eup %4553 }
0x1a05   :  { %3279 = vrot.lane.b32.xlu0 %v4554_v61, %s4699_s24  ;;  %v4556_v33 = vpop.eup %4555 }
0x1a06   :  { %v3036_v0 = vadd.f32 1.0, %v4556_v33 }
0x1a08   :  { %4557 = vrcp.f32 %v3036_v0 }
0x1a09   :  { %4559 = vpow2.f32 %v3575_v4 }
0x1a12   :  { %v4558_v44 = vpop.eup %4557 }
0x1a13   :  { %v4560_v5 = vpop.eup %4559 }
0x1a14   :  { %v3117_v7 = vadd.f32 1.0, %v4560_v5 }
0x1a16   :  { %4561 = vrcp.f32 %v3117_v7 }
0x1a20   :  { %v4562_v8 = vpop.eup %4561 }
0x1a21   :  { %v3277_v9 = vmul.f32 %v4562_v8, %v5384_v36 }
0x1a77   :  { %v3280_v1 = vpop.permute.xlu0 %3279 }
0x1a78   :  { %v3282_v2 = vmul.f32 %v4558_v44, %v3280_v1 }
0x1a7a   :  { %3284 = vrot.lane.b32.xlu0 %v3282_v2, %s4700_s8 }
0x1aec   :  { %v3285_v14 = vpop.permute.xlu0 %3284 }
0x1aed   :  { %v3287_v62 = vadd.f32 %v3285_v14, %v3277_v9 }
0x1aef   :  { %4563 = vtanh.f32 %v3287_v62 }
0x1af0   :  { %4565 = vpow2.f32 %v3578_v15 }
0x1af9   :  { %v4564_v17 = vpop.eup %4563 }
0x1afa   :  { %3290 = vrot.lane.b32.xlu0 %v4564_v17, %s4699_s24  ;;  %v4566_v18 = vpop.eup %4565 }
0x1afb   :  { %v3274_v19 = vadd.f32 1.0, %v4566_v18 }
0x1afd   :  { %4567 = vrcp.f32 %v3274_v19 }
0x1b07   :  { %v4568_v21 = vpop.eup %4567 }
0x1b6c   :  { %v3291_v51 = vpop.permute.xlu0 %3290 }
0x1b6d   :  { %v3293_v22 = vmul.f32 %v4568_v21, %v3291_v51 }
0x1b6f   :  { %3306 = vrot.lane.b32.xlu1 %v3293_v22, %s4700_s8 }
0x1be1   :  { %v3307_v52 = vpop.permute.xlu1 %3306 }
0x1be2   :  { %4171 = vmatmul.mubr.msk.f32.vlgmr.msra.gmra.mrb[40].mxu0 %vm310_vm2, %v3307_v52 }
0x1cb5   :  { %v3376_v48 = vpop.f32.mrb[40].mxu0 }
0x1cb6   :  { %v3377_v25 = vadd.f32 %v3579_v24, %v3376_v48  ;;  %v4172_v50 = vpop.f32.mrb[41].mxu0 }
0x1cb8   :  { %v3382_v28 = vsel %vm310_vm2, %v3377_v25, 0.0 }
0x1cb9   :  { %3383 = vadd.xlane.f32.xlu0 %v3382_v28 }
0x1d46   :  { %v3384_v59 = vpop.xlane.xlu0 %3383 }
0x1d47   :  { %v3385_v30 = vmul.f32 0.03125, %v3384_v59 }
0x1d49   :  { %v3386_v31 = vsub.f32 %v3377_v25, %v3385_v30 }
0x1d4b   :  { %v3387_v35 = vmul.f32 %v3386_v31, %v3386_v31 }
0x1d4d   :  { %v3388_v36 = vsel %vm310_vm2, %v3387_v35, 0.0 }
0x1d4e   :  { %3389 = vadd.xlane.f32.xlu1 %v3388_v36 }
0x1ddb   :  { %v3390_v40 = vpop.xlane.xlu1 %3389 }
0x1ddc   :  { %v3391_v49 = vmul.f32 0.03125, %v3390_v40 }
0x1dde   :  { %v3392_v53 = vadd.f32 1e-05, %v3391_v49 }
0x1de0   :  { %4569 = vrsqrt.f32 %v3392_v53 }
0x1dea   :  { %v4570_v55 = vpop.eup %4569 }
0x1deb   :  { %v3394_v27 = vmul.f32 %v4570_v55, %v3386_v31 }
0x1ded   :  { %v3401_v23 = vmul.f32 %v3581_v20, %v3394_v27 }
0x1def   :  { %v3408_v56 = vadd.f32 %v3582_v54, %v3401_v23 }
0x1df1   :  { %v3410_v29 = vmul.f32 0.70710677, %v3408_v56  ;;  %v3409_v57 = vmul.f32 0.5, %v3408_v56 }
0x1df3   :  { %4571 = verf.f32 %v3410_v29 }
0x1dfd   :  { %v4572_v13 = vpop.eup %4571 }
0x1dfe   :  { %v3412_v26 = vadd.f32 1.0, %v4572_v13 }
0x1e00   :  { %v3413_v58 = vmul.f32 %v3412_v26, %v3409_v57 }
0x1e02   :  { %4182 = vmatmul.mubr.msk.f32.vlgmr.msra.gmra.mrb[40].mxu1 %vm310_vm2, %v3413_v58 }
0x1ed5   :  { %v3494_v61 = vpop.f32.mrb[40].mxu1 }
0x1ed6   :  { %v3495_v16 = vadd.f32 %v3583_v60, %v3494_v61  ;;  %v4183_v63 = vpop.f32.mrb[41].mxu1 }
0x1ed8   :  { %3498 = vst.msk [vmem:[%s5481_s5] sm:$0xff] %vm134_vm1, %v3495_v16 }
0x1ed9   :  { %3503 = vsyncpa [#allocation3], 1 }
0x1eda   :  { %3504 = vsyncpa [#allocation5], 1 }
0x1edb   :  { %3505 = vsyncpa [#allocation8], 1 }

</bundles_post_ra>
